<compile_context>
chip_gen: v6e
topology: v6e:2x2x1
jax: 0.10.0
libtpu: 0.0.40
codegen_flags: <defaults>
</compile_context>

<pallas_src>
import jax
import jax.numpy as jnp
from jax.experimental import pallas as pl
from jax.experimental.pallas import tpu as pltpu


def _silu(x):
    # silu(x) = x * sigmoid(x); sigmoid(x) = 0.5*tanh(0.5*x) + 0.5  (single EUP op).
    # silu(0) == 0, so zero-padded lanes stay exactly zero end-to-end.
    return x * (0.5 * jnp.tanh(0.5 * x) + 0.5)


def _round_up(x, m):
    return ((x + m - 1) // m) * m


def _tpu_generation():
    try:
        kind = jax.devices()[0].device_kind.lower()
    except Exception:
        kind = ""
    if "v7" in kind:
        return "v7x"
    if "v6" in kind:
        return "v6e"
    if "v5e" in kind or "v5 lite" in kind or "v5lite" in kind:
        return "v5e"
    return "other"


# (elementwise dtype, matmul dtype, default tile_i, vmem_limit_bytes)
_DEFAULTS = {
    "v7x":   (jnp.bfloat16, jnp.bfloat16, 64, 40 * 1024 * 1024),    # 64 MiB VMEM / TC
    "v6e":   (jnp.bfloat16, jnp.bfloat16, 128, 80 * 1024 * 1024),   # bf16 VALU/EUP present
    "v5e":   (jnp.float32,  jnp.bfloat16, 128, 100 * 1024 * 1024),  # f32 VPU, bf16 MXU
    "other": (jnp.float32,  jnp.bfloat16, 64, 48 * 1024 * 1024),    # conservative
}


def egnn_kernel(feats_ref, hi_ref, hj_ref, ci_ref, cj_ref, edges_ref,
                mi_ref, mj_ref,
                w1d_ref, w1e_ref, w2_ref, b2_ref,
                w3f_ref, w3m_ref, b3_ref, w4_ref, b4_ref,
                out_ref, acc_ref):
    j = pl.program_id(2)
    nj = pl.num_programs(2)

    @pl.when(j == 0)
    def _():
        acc_ref[...] = jnp.zeros_like(acc_ref)

    hi = hi_ref[0]            # (TI, H1p)  = feats_i @ W1[:D] + b1   (precomputed, ew dtype)
    hj = hj_ref[0]            # (TJ, H1p)  = feats_j @ W1[D:2D]      (precomputed, ew dtype)
    ci = ci_ref[0]            # (TI, 3)   f32
    cj = cj_ref[0]            # (TJ, 3)   f32
    mj = mj_ref[0]            # (TJ, 1)   f32 {0,1}

    ew = hi.dtype
    TI, H1p = hi.shape
    TJ = hj.shape[0]
    E = edges_ref.shape[1]
    Mp = w2_ref.shape[1]

    # squared pairwise distances, built directly in (TI, TJ, 1) sublane-major form so the
    # broadcast over the H1p lane dim below is a lane-0 splat (no lane->sublane relayout).
    rel = jnp.zeros((TI, TJ, 1), jnp.float32)
    for k in range(3):
        d = ci[:, k:k + 1][:, None, :] - cj[:, k:k + 1][None, :, :]   # (TI, TJ, 1)
        rel = rel + d * d
    rel = rel.astype(ew)

    # edge MLP layer 1 on concat(feats_i, feats_j, rel_dist, edges):
    # hi/hj are precomputed matmuls; rel_dist and the E edge features enter as rank-1
    # broadcast-MACs (VPU) — no tiny-K MXU matmul.  Entire chain runs in `ew` (bf16 on
    # v6e/v7x, f32 on v5e).  Edge MACs keep the lane-dense (E,TI,TJ) stream (dense DMA).
    w1d = w1d_ref[...]                         # (1, H1p)  ew
    w1e = w1e_ref[...]                         # (E, H1p)  ew
    e_all = edges_ref[0]                       # (E, TI, TJ) ew — lane dim is TJ
    h1 = hi[:, None, :] + hj[None, :, :] + rel * w1d[None]
    for k in range(E):
        h1 = h1 + e_all[k][:, :, None] * w1e[k:k + 1][None]
    h1 = _silu(h1)                             # (TI, TJ, H1p); dropout = identity (eval)

    # edge MLP layer 2 + SiLU — the dominant matmul; bf16 operands, f32 accumulation.
    mm = w2_ref.dtype
    m_ij = jnp.dot(h1.reshape(TI * TJ, H1p).astype(mm), w2_ref[...],
                   preferred_element_type=jnp.float32) + b2_ref[...]
    m_ij = _silu(m_ij).reshape(TI, TJ, Mp)     # f32 (feeds the f32 accumulator)

    # masked sum-pool over this j-tile; mask_j is (TJ,1) sublane-major so its broadcast over
    # the Mp lane dim is a cheap splat.  mask_i is deferred to the epilogue (once per i-tile).
    acc_ref[...] += jnp.sum(m_ij * mj[None, :, :], axis=1)

    # epilogue: node MLP on concat(feats, m_i) + residual, once all j tiles are pooled.
    @pl.when(j == nj - 1)
    def _():
        fi = feats_ref[0]                      # (TI, D) f32
        mi = mi_ref[0]                         # (TI, 1) f32 {0,1}
        m_i = acc_ref[...] * mi                # apply mask_i once
        h3 = (jnp.dot(fi, w3f_ref[...], preferred_element_type=jnp.float32)
              + jnp.dot(m_i, w3m_ref[...], preferred_element_type=jnp.float32)
              + b3_ref[...])
        h3 = _silu(h3)
        node_out = (jnp.dot(h3, w4_ref[...], preferred_element_type=jnp.float32)
                    + b4_ref[...] + fi)
        out_ref[0] = node_out.astype(out_ref.dtype)


def egnn_module_forward(params, weights, *, tile_i=None, tile_j=None,
                        elementwise_dtype=None, matmul_dtype=None,
                        vmem_limit_bytes=None, edge_buffers=None,
                        single_buffer_weights=False):
    """Pallas implementation of EGNNModule.forward (egnn_nn=0, update_coors=False)."""
    feats, coors, adj, edges, mask = params
    W1, b1, W2, b2, W3, b3, W4, b4 = weights

    B, N, D = feats.shape
    E = edges.shape[-1]
    H1 = W1.shape[1]
    M = W2.shape[1]
    Dh = W3.shape[1]

    d_ew, d_mm, d_ti, d_vmem = _DEFAULTS[_tpu_generation()]
    ew = elementwise_dtype or d_ew
    mm = matmul_dtype or d_mm
    vmem = vmem_limit_bytes or d_vmem

    TI = tile_i or min(N, d_ti)
    TJ = tile_j or min(N, 128)
    assert N % TI == 0 and N % TJ == 0
    assert TI == N or TI % 8 == 0, "tile_i must equal N or be a multiple of 8"
    assert TJ == N or TJ % 128 == 0, "tile_j must equal N or be a multiple of 128"

    # lane-aligned padded widths; padded lanes are exact zeros end-to-end (silu(0)=0).
    H1p = _round_up(H1, 128)
    Mp = _round_up(M, 128)
    Dhp = _round_up(Dh, 128)

    def pad2(w, rows, cols):
        return jnp.pad(w, ((0, rows - w.shape[0]), (0, cols - w.shape[1])))

    # split + pad the concatenation-facing weight matrices
    w1fi = pad2(W1[:D], D, H1p)                             # feats_i part        (D, H1p)
    w1fj = pad2(W1[D:2 * D], D, H1p)                        # feats_j part        (D, H1p)
    w1d = pad2(W1[2 * D:2 * D + 1], 1, H1p).astype(ew)      # rel_dist part       (1, H1p)
    w1e = pad2(W1[2 * D + 1:], E, H1p).astype(ew)           # edge-feature part   (E, H1p)
    b1p = pad2(b1.reshape(1, H1), 1, H1p)
    W2p = pad2(W2, H1p, Mp).astype(mm)                      # (H1p, Mp)
    b2p = pad2(b2.reshape(1, M), 1, Mp)                     # f32
    w3f = pad2(W3[:D], D, Dhp)                              # (D, Dhp)   f32
    w3m = pad2(W3[D:], Mp, Dhp)                             # (Mp, Dhp)  f32
    b3p = pad2(b3.reshape(1, Dh), 1, Dhp)
    W4p = pad2(W4, Dhp, D)                                  # (Dhp, D)   f32
    b4r = b4.reshape(1, D)

    # hoist the i/j-invariant first-layer matmuls out of the kernel (per-batch precompute);
    # cast once to the elementwise dtype (halves their DMA in the bf16 path).
    P = jax.lax.Precision.HIGHEST
    hi_pre = (jnp.dot(feats, w1fi, precision=P) + b1p).astype(ew)   # (B, N, H1p)
    hj_pre = jnp.dot(feats, w1fj, precision=P).astype(ew)           # (B, N, H1p)

    # lane-dense relayouts / dtypes for the kernel
    edges_t = jnp.moveaxis(edges, -1, 1).astype(ew)         # (B, E, N, N): lane dim = N
    maskf_i = mask.astype(jnp.float32)[:, :, None]          # (B, N, 1)
    maskf_j = mask.astype(jnp.float32)[:, :, None]          # (B, N, 1) (j-tile, sublane-major)

    def wspec(shape):
        kw = {}
        if single_buffer_weights:                           # v7x VMEM-saving knob
            kw["pipeline_mode"] = pl.Buffered(1)
        return pl.BlockSpec(shape, lambda b, i, j: (0,) * len(shape), **kw)

    edge_spec_kwargs = {}
    if edge_buffers is not None:                            # opt-in only; off by default
        edge_spec_kwargs["pipeline_mode"] = pl.Buffered(edge_buffers)

    grid = (B, N // TI, N // TJ)
    in_specs = [
        pl.BlockSpec((1, TI, D), lambda b, i, j: (b, i, 0)),            # feats (i tile)
        pl.BlockSpec((1, TI, H1p), lambda b, i, j: (b, i, 0)),          # hi_pre (i tile)
        pl.BlockSpec((1, TJ, H1p), lambda b, i, j: (b, j, 0)),          # hj_pre (j tile)
        pl.BlockSpec((1, TI, 3), lambda b, i, j: (b, i, 0)),            # coors (i tile)
        pl.BlockSpec((1, TJ, 3), lambda b, i, j: (b, j, 0)),            # coors (j tile)
        pl.BlockSpec((1, E, TI, TJ), lambda b, i, j: (b, 0, i, j),
                     **edge_spec_kwargs),                               # edge features
        pl.BlockSpec((1, TI, 1), lambda b, i, j: (b, i, 0)),            # mask_i
        pl.BlockSpec((1, TJ, 1), lambda b, i, j: (b, j, 0)),            # mask_j (sublane-major)
        wspec((1, H1p)), wspec((E, H1p)),
        wspec((H1p, Mp)), wspec((1, Mp)),
        wspec((D, Dhp)), wspec((Mp, Dhp)), wspec((1, Dhp)),
        wspec((Dhp, D)), wspec((1, D)),
    ]
    out_specs = pl.BlockSpec((1, TI, D), lambda b, i, j: (b, i, 0))

    node_out = pl.pallas_call(
        egnn_kernel,
        out_shape=jax.ShapeDtypeStruct((B, N, D), feats.dtype),
        grid_spec=pltpu.PrefetchScalarGridSpec(
            num_scalar_prefetch=0,
            grid=grid,
            in_specs=in_specs,
            out_specs=out_specs,
            scratch_shapes=[pltpu.VMEM((TI, Mp), jnp.float32)]),
        compiler_params=pltpu.CompilerParams(
            dimension_semantics=("parallel", "parallel", "arbitrary"),
            vmem_limit_bytes=vmem),
    )(feats, hi_pre, hj_pre, coors, coors, edges_t, maskf_i, maskf_j,
      w1d, w1e, W2p, b2p, w3f, w3m, b3p, W4p, b4r)

    # update_coors=False -> coordinates pass through unchanged
    return node_out, coors, adj, edges, mask


def egnn_reference(params, weights):
    """Pure-JAX mirror of the PyTorch dense EGNN forward (for correctness checks)."""
    feats, coors, adj, edges, mask = params
    W1, b1, W2, b2, W3, b3, W4, b4 = weights
    B, N, D = feats.shape
    P = jax.lax.Precision.HIGHEST

    rel = coors[:, :, None, :] - coors[:, None, :, :]
    rel_dist = jnp.sum(rel * rel, axis=-1, keepdims=True)          # (B,N,N,1)
    fi = jnp.broadcast_to(feats[:, :, None, :], (B, N, N, D))
    fj = jnp.broadcast_to(feats[:, None, :, :], (B, N, N, D))
    edge_input = jnp.concatenate([fi, fj, rel_dist, edges], axis=-1)

    h = _silu(jnp.matmul(edge_input, W1, precision=P) + b1)
    m_ij = _silu(jnp.matmul(h, W2, precision=P) + b2)

    mf = mask.astype(jnp.float32)
    pair = mf[:, :, None] * mf[:, None, :]
    m_ij = m_ij * pair[..., None]
    m_i = m_ij.sum(axis=2)

    node_in = jnp.concatenate([feats, m_i], axis=-1)
    node_out = (jnp.matmul(_silu(jnp.matmul(node_in, W3, precision=P) + b3),
                           W4, precision=P) + b4 + feats)
    return node_out, coors


def make_weights(key, D, M, E):
    Ein = 2 * D + 1 + E
    H1 = 2 * Ein
    Dh = 2 * D
    ks = jax.random.split(key, 8)
    W1 = 0.1 * jax.random.normal(ks[0], (Ein, H1), jnp.float32)
    b1 = 0.01 * jax.random.normal(ks[1], (H1,), jnp.float32)
    W2 = 0.1 * jax.random.normal(ks[2], (H1, M), jnp.float32)
    b2 = 0.01 * jax.random.normal(ks[3], (M,), jnp.float32)
    W3 = 0.1 * jax.random.normal(ks[4], (D + M, Dh), jnp.float32)
    b3 = 0.01 * jax.random.normal(ks[5], (Dh,), jnp.float32)
    W4 = 0.1 * jax.random.normal(ks[6], (Dh, D), jnp.float32)
    b4 = 0.01 * jax.random.normal(ks[7], (D,), jnp.float32)
    return (W1, b1, W2, b2, W3, b3, W4, b4)


def make_inputs(key, B, N, D, E):
    k_emb, k_coor, k_adj, k_edge, k_mask = jax.random.split(key, 5)
    emb = jax.random.normal(k_emb, (B, N, D), jnp.float32)
    coors = jax.random.normal(k_coor, (B, N, 3), jnp.float32)
    adj = jax.random.bernoulli(k_adj, 0.3, (B, N, N))            # passed through (egnn_nn=0)
    feat = jax.random.normal(k_edge, (B, N, N, E), jnp.float32)  # edge features
    mask = jax.random.bernoulli(k_mask, 0.8, (B, N))
    return (emb, coors, adj, feat, mask)


def _norm_err(out, ref):
    return float(jnp.max(jnp.abs(out - ref)) / (jnp.max(jnp.abs(ref)) + 1.0))


if __name__ == "__main__":
    # TODO(synk): the kNN / only_sparse_neighbors (topk + gather) path is not implemented
    # in-kernel; this kernel realises the exact dense configuration egnn_nn=0, only_sparse=False.

    key = jax.random.PRNGKey(0)
    k_in, k_w, k_in2 = jax.random.split(key, 3)

    # ---- small smoke test: batch=2, nodes=8, embedding_dim=32, m_dim=16, edge_dim=4 ----
    B, N, D, M, E = 2, 8, 32, 16, 4
    weights = make_weights(k_w, D, M, E)
    params = make_inputs(k_in, B, N, D, E)
    ref_out, ref_coors = egnn_reference(params, weights)

    # exact f32 path
    out, coors_out, *_ = egnn_module_forward(
        params, weights, elementwise_dtype=jnp.float32, matmul_dtype=jnp.float32)
    jax.block_until_ready(out)
    assert jnp.allclose(out, ref_out, rtol=1e-4, atol=1e-4), "f32 kernel mismatch vs reference"
    assert jnp.array_equal(coors_out, ref_coors)

    # hardware-default fast path (bf16 h1/MXU on v6e/v7x, f32 VPU + bf16 MXU on v5e)
    out_fast, *_ = egnn_module_forward(params, weights)
    jax.block_until_ready(out_fast)
    assert _norm_err(out_fast, ref_out) < 5e-2, "fast path out of tolerance (N=8)"

    # ---- multi-tile test: N=256 exercises the j-reduction accumulator and TJ=128 lanes ----
    B2, N2 = 2, 256
    params2 = make_inputs(k_in2, B2, N2, D, E)
    ref_out2, ref_coors2 = egnn_reference(params2, weights)

    out2, coors_out2, *_ = egnn_module_forward(
        params2, weights, tile_i=32, elementwise_dtype=jnp.float32, matmul_dtype=jnp.float32)
    jax.block_until_ready(out2)
    assert _norm_err(out2, ref_out2) < 1e-3, "f32 multi-tile kernel mismatch vs reference"
    assert jnp.array_equal(coors_out2, ref_coors2)

    out2_fast, *_ = egnn_module_forward(params2, weights)   # auto per-chip defaults
    jax.block_until_ready(out2_fast)
    assert _norm_err(out2_fast, ref_out2) < 5e-2, "fast path out of tolerance (N=256)"

    print("KERNEL_OK")
</pallas_src>

<mosaic_0001>
module attributes {stable_mosaic.version = 11 : i64} {
  func.func @egnn_kernel(%arg0: i32, %arg1: i32, %arg2: i32, %arg3: memref<1x8x32xf32, #tpu.memory_space<vmem>>, %arg4: memref<1x8x256xf32, #tpu.memory_space<vmem>>, %arg5: memref<1x8x256xf32, #tpu.memory_space<vmem>>, %arg6: memref<1x8x3xf32, #tpu.memory_space<vmem>>, %arg7: memref<1x8x3xf32, #tpu.memory_space<vmem>>, %arg8: memref<1x4x8x8xf32, #tpu.memory_space<vmem>>, %arg9: memref<1x8x1xf32, #tpu.memory_space<vmem>>, %arg10: memref<1x8x1xf32, #tpu.memory_space<vmem>>, %arg11: memref<1x256xf32, #tpu.memory_space<vmem>>, %arg12: memref<4x256xf32, #tpu.memory_space<vmem>>, %arg13: memref<256x128xf32, #tpu.memory_space<vmem>>, %arg14: memref<1x128xf32, #tpu.memory_space<vmem>>, %arg15: memref<32x128xf32, #tpu.memory_space<vmem>>, %arg16: memref<128x128xf32, #tpu.memory_space<vmem>>, %arg17: memref<1x128xf32, #tpu.memory_space<vmem>>, %arg18: memref<128x32xf32, #tpu.memory_space<vmem>>, %arg19: memref<1x32xf32, #tpu.memory_space<vmem>>, %arg20: memref<1x8x32xf32, #tpu.memory_space<vmem>>, %arg21: memref<8x128xf32, #tpu.memory_space<vmem>>) attributes {dimension_semantics = [#tpu.dimension_semantics<parallel>, #tpu.dimension_semantics<parallel>, #tpu.dimension_semantics<arbitrary>], iteration_bounds = array<i64: 2, 1, 1>, scalar_prefetch = 0 : i64, scratch_operands = 1 : i64, tpu.core_type = #tpu.core_type<tc>, window_params = [{transform_indices = @transform_0, window_bounds = array<i64: 1, 8, 32>}, {transform_indices = @transform_1, window_bounds = array<i64: 1, 8, 256>}, {transform_indices = @transform_2, window_bounds = array<i64: 1, 8, 256>}, {transform_indices = @transform_3, window_bounds = array<i64: 1, 8, 3>}, {transform_indices = @transform_4, window_bounds = array<i64: 1, 8, 3>}, {transform_indices = @transform_5, window_bounds = array<i64: 1, 4, 8, 8>}, {transform_indices = @transform_6, window_bounds = array<i64: 1, 8, 1>}, {transform_indices = @transform_7, window_bounds = array<i64: 1, 8, 1>}, {pipeline_mode = #tpu.pipeline_mode<synchronous>, transform_indices = @transform_8, window_bounds = array<i64: 1, 256>}, {pipeline_mode = #tpu.pipeline_mode<synchronous>, transform_indices = @transform_9, window_bounds = array<i64: 4, 256>}, {pipeline_mode = #tpu.pipeline_mode<synchronous>, transform_indices = @transform_10, window_bounds = array<i64: 256, 128>}, {pipeline_mode = #tpu.pipeline_mode<synchronous>, transform_indices = @transform_11, window_bounds = array<i64: 1, 128>}, {pipeline_mode = #tpu.pipeline_mode<synchronous>, transform_indices = @transform_12, window_bounds = array<i64: 32, 128>}, {pipeline_mode = #tpu.pipeline_mode<synchronous>, transform_indices = @transform_13, window_bounds = array<i64: 128, 128>}, {pipeline_mode = #tpu.pipeline_mode<synchronous>, transform_indices = @transform_14, window_bounds = array<i64: 1, 128>}, {pipeline_mode = #tpu.pipeline_mode<synchronous>, transform_indices = @transform_15, window_bounds = array<i64: 128, 32>}, {pipeline_mode = #tpu.pipeline_mode<synchronous>, transform_indices = @transform_16, window_bounds = array<i64: 1, 32>}, {transform_indices = @transform_17, window_bounds = array<i64: 1, 8, 32>}]} {
    %c0_i32 = arith.constant 0 : i32
    %0 = arith.cmpi eq, %arg2, %c0_i32 : i32
    %1 = arith.extui %0 : i1 to i32
    %c0_i32_0 = arith.constant 0 : i32
    %2 = arith.cmpi ne, %1, %c0_i32_0 : i32
    scf.if %2 {
      %cst_41 = arith.constant 0.000000e+00 : f32
      %124 = vector.broadcast %cst_41 : f32 to vector<8x128xf32>
      %c0_42 = arith.constant 0 : index
      %c0_43 = arith.constant 0 : index
      %125 = vector.load %arg21[%c0_42, %c0_43] : memref<8x128xf32, #tpu.memory_space<vmem>>, vector<8x128xf32>
      tpu.vector_store %arg21[%c0_42, %c0_43], %124 {strides = array<i32>} : memref<8x128xf32, #tpu.memory_space<vmem>>, vector<8x128xf32>,
    } else {
    }
    %c0 = arith.constant 0 : index
    %c0_1 = arith.constant 0 : index
    %c0_2 = arith.constant 0 : index
    %3 = vector.load %arg4[%c0, %c0_1, %c0_2] : memref<1x8x256xf32, #tpu.memory_space<vmem>>, vector<1x8x256xf32>
    %4 = vector.shape_cast %3 : vector<1x8x256xf32> to vector<8x256xf32>
    %c0_3 = arith.constant 0 : index
    %c0_4 = arith.constant 0 : index
    %c0_5 = arith.constant 0 : index
    %5 = vector.load %arg5[%c0_3, %c0_4, %c0_5] : memref<1x8x256xf32, #tpu.memory_space<vmem>>, vector<1x8x256xf32>
    %6 = vector.shape_cast %5 : vector<1x8x256xf32> to vector<8x256xf32>
    %c0_6 = arith.constant 0 : index
    %c0_7 = arith.constant 0 : index
    %c0_8 = arith.constant 0 : index
    %7 = vector.load %arg6[%c0_6, %c0_7, %c0_8] : memref<1x8x3xf32, #tpu.memory_space<vmem>>, vector<1x8x3xf32>
    %8 = vector.shape_cast %7 : vector<1x8x3xf32> to vector<8x3xf32>
    %c0_9 = arith.constant 0 : index
    %c0_10 = arith.constant 0 : index
    %c0_11 = arith.constant 0 : index
    %9 = vector.load %arg7[%c0_9, %c0_10, %c0_11] : memref<1x8x3xf32, #tpu.memory_space<vmem>>, vector<1x8x3xf32>
    %10 = vector.shape_cast %9 : vector<1x8x3xf32> to vector<8x3xf32>
    %c0_12 = arith.constant 0 : index
    %c0_13 = arith.constant 0 : index
    %c0_14 = arith.constant 0 : index
    %11 = vector.load %arg10[%c0_12, %c0_13, %c0_14] : memref<1x8x1xf32, #tpu.memory_space<vmem>>, vector<1x8x1xf32>
    %12 = vector.shape_cast %11 : vector<1x8x1xf32> to vector<8x1xf32>
    %cst = arith.constant 0.000000e+00 : f32
    %13 = vector.broadcast %cst : f32 to vector<8x8x1xf32>
    %14 = vector.extract_strided_slice %8 {offsets = [0, 0], sizes = [8, 1], strides = [1, 1]} : vector<8x3xf32> to vector<8x1xf32>
    %15 = vector.shape_cast %14 : vector<8x1xf32> to vector<8x1x1xf32>
    %16 = vector.extract_strided_slice %10 {offsets = [0, 0], sizes = [8, 1], strides = [1, 1]} : vector<8x3xf32> to vector<8x1xf32>
    %17 = vector.shape_cast %16 : vector<8x1xf32> to vector<1x8x1xf32>
    %18 = vector.broadcast %15 : vector<8x1x1xf32> to vector<8x8x1xf32>
    %19 = vector.broadcast %17 : vector<1x8x1xf32> to vector<8x8x1xf32>
    %20 = arith.subf %18, %19 : vector<8x8x1xf32>
    %21 = arith.mulf %20, %20 : vector<8x8x1xf32>
    %22 = arith.addf %13, %21 : vector<8x8x1xf32>
    %23 = vector.extract_strided_slice %8 {offsets = [0, 1], sizes = [8, 1], strides = [1, 1]} : vector<8x3xf32> to vector<8x1xf32>
    %24 = vector.shape_cast %23 : vector<8x1xf32> to vector<8x1x1xf32>
    %25 = vector.extract_strided_slice %10 {offsets = [0, 1], sizes = [8, 1], strides = [1, 1]} : vector<8x3xf32> to vector<8x1xf32>
    %26 = vector.shape_cast %25 : vector<8x1xf32> to vector<1x8x1xf32>
    %27 = vector.broadcast %24 : vector<8x1x1xf32> to vector<8x8x1xf32>
    %28 = vector.broadcast %26 : vector<1x8x1xf32> to vector<8x8x1xf32>
    %29 = arith.subf %27, %28 : vector<8x8x1xf32>
    %30 = arith.mulf %29, %29 : vector<8x8x1xf32>
    %31 = arith.addf %22, %30 : vector<8x8x1xf32>
    %32 = vector.extract_strided_slice %8 {offsets = [0, 2], sizes = [8, 1], strides = [1, 1]} : vector<8x3xf32> to vector<8x1xf32>
    %33 = vector.shape_cast %32 : vector<8x1xf32> to vector<8x1x1xf32>
    %34 = vector.extract_strided_slice %10 {offsets = [0, 2], sizes = [8, 1], strides = [1, 1]} : vector<8x3xf32> to vector<8x1xf32>
    %35 = vector.shape_cast %34 : vector<8x1xf32> to vector<1x8x1xf32>
    %36 = vector.broadcast %33 : vector<8x1x1xf32> to vector<8x8x1xf32>
    %37 = vector.broadcast %35 : vector<1x8x1xf32> to vector<8x8x1xf32>
    %38 = arith.subf %36, %37 : vector<8x8x1xf32>
    %39 = arith.mulf %38, %38 : vector<8x8x1xf32>
    %40 = arith.addf %31, %39 : vector<8x8x1xf32>
    %c0_15 = arith.constant 0 : index
    %c0_16 = arith.constant 0 : index
    %41 = vector.load %arg11[%c0_15, %c0_16] : memref<1x256xf32, #tpu.memory_space<vmem>>, vector<1x256xf32>
    %c0_17 = arith.constant 0 : index
    %c0_18 = arith.constant 0 : index
    %42 = vector.load %arg12[%c0_17, %c0_18] : memref<4x256xf32, #tpu.memory_space<vmem>>, vector<4x256xf32>
    %c0_19 = arith.constant 0 : index
    %c0_20 = arith.constant 0 : index
    %c0_21 = arith.constant 0 : index
    %c0_22 = arith.constant 0 : index
    %43 = vector.load %arg8[%c0_19, %c0_20, %c0_21, %c0_22] : memref<1x4x8x8xf32, #tpu.memory_space<vmem>>, vector<1x4x8x8xf32>
    %44 = vector.shape_cast %43 : vector<1x4x8x8xf32> to vector<4x8x8xf32>
    %45 = vector.shape_cast %4 : vector<8x256xf32> to vector<8x1x256xf32>
    %46 = vector.shape_cast %6 : vector<8x256xf32> to vector<1x8x256xf32>
    %47 = vector.broadcast %45 : vector<8x1x256xf32> to vector<8x8x256xf32>
    %48 = vector.broadcast %46 : vector<1x8x256xf32> to vector<8x8x256xf32>
    %49 = arith.addf %47, %48 : vector<8x8x256xf32>
    %50 = vector.shape_cast %41 : vector<1x256xf32> to vector<1x1x256xf32>
    %51 = vector.broadcast %40 : vector<8x8x1xf32> to vector<8x8x256xf32>
    %52 = vector.broadcast %50 : vector<1x1x256xf32> to vector<8x8x256xf32>
    %53 = arith.mulf %51, %52 : vector<8x8x256xf32>
    %54 = arith.addf %49, %53 : vector<8x8x256xf32>
    %55 = vector.extract_strided_slice %44 {offsets = [0, 0, 0], sizes = [1, 8, 8], strides = [1, 1, 1]} : vector<4x8x8xf32> to vector<1x8x8xf32>
    %56 = vector.shape_cast %55 : vector<1x8x8xf32> to vector<8x8xf32>
    %57 = vector.shape_cast %56 : vector<8x8xf32> to vector<8x8x1xf32>
    %58 = vector.extract_strided_slice %42 {offsets = [0, 0], sizes = [1, 256], strides = [1, 1]} : vector<4x256xf32> to vector<1x256xf32>
    %59 = vector.shape_cast %58 : vector<1x256xf32> to vector<1x1x256xf32>
    %60 = vector.broadcast %57 : vector<8x8x1xf32> to vector<8x8x256xf32>
    %61 = vector.broadcast %59 : vector<1x1x256xf32> to vector<8x8x256xf32>
    %62 = arith.mulf %60, %61 : vector<8x8x256xf32>
    %63 = arith.addf %54, %62 : vector<8x8x256xf32>
    %64 = vector.extract_strided_slice %44 {offsets = [1, 0, 0], sizes = [1, 8, 8], strides = [1, 1, 1]} : vector<4x8x8xf32> to vector<1x8x8xf32>
    %65 = vector.shape_cast %64 : vector<1x8x8xf32> to vector<8x8xf32>
    %66 = vector.shape_cast %65 : vector<8x8xf32> to vector<8x8x1xf32>
    %67 = vector.extract_strided_slice %42 {offsets = [1, 0], sizes = [1, 256], strides = [1, 1]} : vector<4x256xf32> to vector<1x256xf32>
    %68 = vector.shape_cast %67 : vector<1x256xf32> to vector<1x1x256xf32>
    %69 = vector.broadcast %66 : vector<8x8x1xf32> to vector<8x8x256xf32>
    %70 = vector.broadcast %68 : vector<1x1x256xf32> to vector<8x8x256xf32>
    %71 = arith.mulf %69, %70 : vector<8x8x256xf32>
    %72 = arith.addf %63, %71 : vector<8x8x256xf32>
    %73 = vector.extract_strided_slice %44 {offsets = [2, 0, 0], sizes = [1, 8, 8], strides = [1, 1, 1]} : vector<4x8x8xf32> to vector<1x8x8xf32>
    %74 = vector.shape_cast %73 : vector<1x8x8xf32> to vector<8x8xf32>
    %75 = vector.shape_cast %74 : vector<8x8xf32> to vector<8x8x1xf32>
    %76 = vector.extract_strided_slice %42 {offsets = [2, 0], sizes = [1, 256], strides = [1, 1]} : vector<4x256xf32> to vector<1x256xf32>
    %77 = vector.shape_cast %76 : vector<1x256xf32> to vector<1x1x256xf32>
    %78 = vector.broadcast %75 : vector<8x8x1xf32> to vector<8x8x256xf32>
    %79 = vector.broadcast %77 : vector<1x1x256xf32> to vector<8x8x256xf32>
    %80 = arith.mulf %78, %79 : vector<8x8x256xf32>
    %81 = arith.addf %72, %80 : vector<8x8x256xf32>
    %82 = vector.extract_strided_slice %44 {offsets = [3, 0, 0], sizes = [1, 8, 8], strides = [1, 1, 1]} : vector<4x8x8xf32> to vector<1x8x8xf32>
    %83 = vector.shape_cast %82 : vector<1x8x8xf32> to vector<8x8xf32>
    %84 = vector.shape_cast %83 : vector<8x8xf32> to vector<8x8x1xf32>
    %85 = vector.extract_strided_slice %42 {offsets = [3, 0], sizes = [1, 256], strides = [1, 1]} : vector<4x256xf32> to vector<1x256xf32>
    %86 = vector.shape_cast %85 : vector<1x256xf32> to vector<1x1x256xf32>
    %87 = vector.broadcast %84 : vector<8x8x1xf32> to vector<8x8x256xf32>
    %88 = vector.broadcast %86 : vector<1x1x256xf32> to vector<8x8x256xf32>
    %89 = arith.mulf %87, %88 : vector<8x8x256xf32>
    %90 = arith.addf %81, %89 : vector<8x8x256xf32>
    %cst_23 = arith.constant 5.000000e-01 : f32
    %91 = vector.broadcast %cst_23 : f32 to vector<8x8x256xf32>
    %92 = arith.mulf %91, %90 : vector<8x8x256xf32>
    %93 = math.tanh %92 : vector<8x8x256xf32>
    %cst_24 = arith.constant 5.000000e-01 : f32
    %94 = vector.broadcast %cst_24 : f32 to vector<8x8x256xf32>
    %95 = arith.mulf %94, %93 : vector<8x8x256xf32>
    %cst_25 = arith.constant 5.000000e-01 : f32
    %96 = vector.broadcast %cst_25 : f32 to vector<8x8x256xf32>
    %97 = arith.addf %95, %96 : vector<8x8x256xf32>
    %98 = arith.mulf %90, %97 : vector<8x8x256xf32>
    %99 = vector.shape_cast %98 : vector<8x8x256xf32> to vector<64x256xf32>
    %c0_26 = arith.constant 0 : index
    %c0_27 = arith.constant 0 : index
    %100 = vector.load %arg13[%c0_26, %c0_27] : memref<256x128xf32, #tpu.memory_space<vmem>>, vector<256x128xf32>
    %cst_28 = arith.constant dense<0.000000e+00> : vector<64x128xf32>
    %101 = tpu.matmul %99, %100, %cst_28 {dimension_numbers = #tpu.dot_dimension_numbers<[1], [0], [0], [1], [0, 0, 1, 1], [], []>} : vector<64x256xf32>, vector<256x128xf32>, vector<64x128xf32> -> vector<64x128xf32>
    %c0_29 = arith.constant 0 : index
    %c0_30 = arith.constant 0 : index
    %102 = vector.load %arg14[%c0_29, %c0_30] : memref<1x128xf32, #tpu.memory_space<vmem>>, vector<1x128xf32>
    %103 = vector.broadcast %102 : vector<1x128xf32> to vector<64x128xf32>
    %104 = arith.addf %101, %103 : vector<64x128xf32>
    %cst_31 = arith.constant 5.000000e-01 : f32
    %105 = vector.broadcast %cst_31 : f32 to vector<64x128xf32>
    %106 = arith.mulf %105, %104 : vector<64x128xf32>
    %107 = math.tanh %106 : vector<64x128xf32>
    %cst_32 = arith.constant 5.000000e-01 : f32
    %108 = vector.broadcast %cst_32 : f32 to vector<64x128xf32>
    %109 = arith.mulf %108, %107 : vector<64x128xf32>
    %cst_33 = arith.constant 5.000000e-01 : f32
    %110 = vector.broadcast %cst_33 : f32 to vector<64x128xf32>
    %111 = arith.addf %109, %110 : vector<64x128xf32>
    %112 = arith.mulf %104, %111 : vector<64x128xf32>
    %113 = vector.shape_cast %112 : vector<64x128xf32> to vector<8x8x128xf32>
    %c0_34 = arith.constant 0 : index
    %c0_35 = arith.constant 0 : index
    %114 = vector.load %arg21[%c0_34, %c0_35] : memref<8x128xf32, #tpu.memory_space<vmem>>, vector<8x128xf32>
    %115 = vector.shape_cast %12 : vector<8x1xf32> to vector<1x8x1xf32>
    %116 = vector.broadcast %115 : vector<1x8x1xf32> to vector<8x8x128xf32>
    %117 = arith.mulf %113, %116 : vector<8x8x128xf32>
    %cst_36 = arith.constant dense<0.000000e+00> : vector<8x128xf32>
    %118 = vector.multi_reduction <add>, %117, %cst_36 [1] : vector<8x8x128xf32> to vector<8x128xf32>
    %119 = arith.addf %114, %118 : vector<8x128xf32>
    %c0_37 = arith.constant 0 : index
    %c0_38 = arith.constant 0 : index
    %120 = vector.load %arg21[%c0_37, %c0_38] : memref<8x128xf32, #tpu.memory_space<vmem>>, vector<8x128xf32>
    tpu.vector_store %arg21[%c0_37, %c0_38], %119 {strides = array<i32>} : memref<8x128xf32, #tpu.memory_space<vmem>>, vector<8x128xf32>,
    %c0_i32_39 = arith.constant 0 : i32
    %121 = arith.cmpi eq, %arg2, %c0_i32_39 : i32
    %122 = arith.extui %121 : i1 to i32
    %c0_i32_40 = arith.constant 0 : i32
    %123 = arith.cmpi ne, %122, %c0_i32_40 : i32
    scf.if %123 {
      %c0_41 = arith.constant 0 : index
      %c0_42 = arith.constant 0 : index
      %c0_43 = arith.constant 0 : index
      %124 = vector.load %arg3[%c0_41, %c0_42, %c0_43] : memref<1x8x32xf32, #tpu.memory_space<vmem>>, vector<1x8x32xf32>
      %125 = vector.shape_cast %124 : vector<1x8x32xf32> to vector<8x32xf32>
      %c0_44 = arith.constant 0 : index
      %c0_45 = arith.constant 0 : index
      %c0_46 = arith.constant 0 : index
      %126 = vector.load %arg9[%c0_44, %c0_45, %c0_46] : memref<1x8x1xf32, #tpu.memory_space<vmem>>, vector<1x8x1xf32>
      %127 = vector.shape_cast %126 : vector<1x8x1xf32> to vector<8x1xf32>
      %c0_47 = arith.constant 0 : index
      %c0_48 = arith.constant 0 : index
      %128 = vector.load %arg21[%c0_47, %c0_48] : memref<8x128xf32, #tpu.memory_space<vmem>>, vector<8x128xf32>
      %129 = vector.broadcast %127 : vector<8x1xf32> to vector<8x128xf32>
      %130 = arith.mulf %128, %129 : vector<8x128xf32>
      %c0_49 = arith.constant 0 : index
      %c0_50 = arith.constant 0 : index
      %131 = vector.load %arg15[%c0_49, %c0_50] : memref<32x128xf32, #tpu.memory_space<vmem>>, vector<32x128xf32>
      %cst_51 = arith.constant dense<0.000000e+00> : vector<8x128xf32>
      %132 = tpu.matmul %125, %131, %cst_51 {dimension_numbers = #tpu.dot_dimension_numbers<[1], [0], [0], [1], [0, 0, 1, 1], [], []>} : vector<8x32xf32>, vector<32x128xf32>, vector<8x128xf32> -> vector<8x128xf32>
      %c0_52 = arith.constant 0 : index
      %c0_53 = arith.constant 0 : index
      %133 = vector.load %arg16[%c0_52, %c0_53] : memref<128x128xf32, #tpu.memory_space<vmem>>, vector<128x128xf32>
      %cst_54 = arith.constant dense<0.000000e+00> : vector<8x128xf32>
      %134 = tpu.matmul %130, %133, %cst_54 {dimension_numbers = #tpu.dot_dimension_numbers<[1], [0], [0], [1], [0, 0, 1, 1], [], []>} : vector<8x128xf32>, vector<128x128xf32>, vector<8x128xf32> -> vector<8x128xf32>
      %135 = arith.addf %132, %134 : vector<8x128xf32>
      %c0_55 = arith.constant 0 : index
      %c0_56 = arith.constant 0 : index
      %136 = vector.load %arg17[%c0_55, %c0_56] : memref<1x128xf32, #tpu.memory_space<vmem>>, vector<1x128xf32>
      %137 = vector.broadcast %136 : vector<1x128xf32> to vector<8x128xf32>
      %138 = arith.addf %135, %137 : vector<8x128xf32>
      %cst_57 = arith.constant 5.000000e-01 : f32
      %139 = vector.broadcast %cst_57 : f32 to vector<8x128xf32>
      %140 = arith.mulf %139, %138 : vector<8x128xf32>
      %141 = math.tanh %140 : vector<8x128xf32>
      %cst_58 = arith.constant 5.000000e-01 : f32
      %142 = vector.broadcast %cst_58 : f32 to vector<8x128xf32>
      %143 = arith.mulf %142, %141 : vector<8x128xf32>
      %cst_59 = arith.constant 5.000000e-01 : f32
      %144 = vector.broadcast %cst_59 : f32 to vector<8x128xf32>
      %145 = arith.addf %143, %144 : vector<8x128xf32>
      %146 = arith.mulf %138, %145 : vector<8x128xf32>
      %c0_60 = arith.constant 0 : index
      %c0_61 = arith.constant 0 : index
      %147 = vector.load %arg18[%c0_60, %c0_61] : memref<128x32xf32, #tpu.memory_space<vmem>>, vector<128x32xf32>
      %cst_62 = arith.constant dense<0.000000e+00> : vector<8x32xf32>
      %148 = tpu.matmul %146, %147, %cst_62 {dimension_numbers = #tpu.dot_dimension_numbers<[1], [0], [0], [1], [0, 0, 1, 1], [], []>} : vector<8x128xf32>, vector<128x32xf32>, vector<8x32xf32> -> vector<8x32xf32>
      %c0_63 = arith.constant 0 : index
      %c0_64 = arith.constant 0 : index
      %149 = vector.load %arg19[%c0_63, %c0_64] : memref<1x32xf32, #tpu.memory_space<vmem>>, vector<1x32xf32>
      %150 = vector.broadcast %149 : vector<1x32xf32> to vector<8x32xf32>
      %151 = arith.addf %148, %150 : vector<8x32xf32>
      %152 = arith.addf %151, %125 : vector<8x32xf32>
      %c0_65 = arith.constant 0 : index
      %c0_66 = arith.constant 0 : index
      %c0_67 = arith.constant 0 : index
      %153 = vector.load %arg20[%c0_65, %c0_66, %c0_67] : memref<1x8x32xf32, #tpu.memory_space<vmem>>, vector<1x8x32xf32>
      %154 = vector.shape_cast %153 : vector<1x8x32xf32> to vector<8x32xf32>
      %155 = vector.shape_cast %152 : vector<8x32xf32> to vector<1x8x32xf32>
      tpu.vector_store %arg20[%c0_65, %c0_66, %c0_67], %155 {strides = array<i32>} : memref<1x8x32xf32, #tpu.memory_space<vmem>>, vector<1x8x32xf32>,
    } else {
    }
    return
  }
  func.func @transform_0(%arg0: i32, %arg1: i32, %arg2: i32) -> (i32, i32, i32) {
    %c0_i32 = arith.constant 0 : i32
    %c0_i32_0 = arith.constant 0 : i32
    return %arg0, %arg1, %c0_i32 : i32, i32, i32
  }
  func.func @transform_1(%arg0: i32, %arg1: i32, %arg2: i32) -> (i32, i32, i32) {
    %c0_i32 = arith.constant 0 : i32
    %c0_i32_0 = arith.constant 0 : i32
    return %arg0, %arg1, %c0_i32 : i32, i32, i32
  }
  func.func @transform_2(%arg0: i32, %arg1: i32, %arg2: i32) -> (i32, i32, i32) {
    %c0_i32 = arith.constant 0 : i32
    %c0_i32_0 = arith.constant 0 : i32
    return %arg0, %arg2, %c0_i32 : i32, i32, i32
  }
  func.func @transform_3(%arg0: i32, %arg1: i32, %arg2: i32) -> (i32, i32, i32) {
    %c0_i32 = arith.constant 0 : i32
    %c0_i32_0 = arith.constant 0 : i32
    return %arg0, %arg1, %c0_i32 : i32, i32, i32
  }
  func.func @transform_4(%arg0: i32, %arg1: i32, %arg2: i32) -> (i32, i32, i32) {
    %c0_i32 = arith.constant 0 : i32
    %c0_i32_0 = arith.constant 0 : i32
    return %arg0, %arg2, %c0_i32 : i32, i32, i32
  }
  func.func @transform_5(%arg0: i32, %arg1: i32, %arg2: i32) -> (i32, i32, i32, i32) {
    %c0_i32 = arith.constant 0 : i32
    %c0_i32_0 = arith.constant 0 : i32
    return %arg0, %c0_i32, %arg1, %arg2 : i32, i32, i32, i32
  }
  func.func @transform_6(%arg0: i32, %arg1: i32, %arg2: i32) -> (i32, i32, i32) {
    %c0_i32 = arith.constant 0 : i32
    %c0_i32_0 = arith.constant 0 : i32
    return %arg0, %arg1, %c0_i32 : i32, i32, i32
  }
  func.func @transform_7(%arg0: i32, %arg1: i32, %arg2: i32) -> (i32, i32, i32) {
    %c0_i32 = arith.constant 0 : i32
    %c0_i32_0 = arith.constant 0 : i32
    return %arg0, %arg2, %c0_i32 : i32, i32, i32
  }
  func.func @transform_8(%arg0: i32, %arg1: i32, %arg2: i32) -> (i32, i32) {
    %c0_i32 = arith.constant 0 : i32
    %c0_i32_0 = arith.constant 0 : i32
    %c0_i32_1 = arith.constant 0 : i32
    return %c0_i32, %c0_i32_0 : i32, i32
  }
  func.func @transform_9(%arg0: i32, %arg1: i32, %arg2: i32) -> (i32, i32) {
    %c0_i32 = arith.constant 0 : i32
    %c0_i32_0 = arith.constant 0 : i32
    %c0_i32_1 = arith.constant 0 : i32
    return %c0_i32, %c0_i32_0 : i32, i32
  }
  func.func @transform_10(%arg0: i32, %arg1: i32, %arg2: i32) -> (i32, i32) {
    %c0_i32 = arith.constant 0 : i32
    %c0_i32_0 = arith.constant 0 : i32
    %c0_i32_1 = arith.constant 0 : i32
    return %c0_i32, %c0_i32_0 : i32, i32
  }
  func.func @transform_11(%arg0: i32, %arg1: i32, %arg2: i32) -> (i32, i32) {
    %c0_i32 = arith.constant 0 : i32
    %c0_i32_0 = arith.constant 0 : i32
    %c0_i32_1 = arith.constant 0 : i32
    return %c0_i32, %c0_i32_0 : i32, i32
  }
  func.func @transform_12(%arg0: i32, %arg1: i32, %arg2: i32) -> (i32, i32) {
    %c0_i32 = arith.constant 0 : i32
    %c0_i32_0 = arith.constant 0 : i32
    %c0_i32_1 = arith.constant 0 : i32
    return %c0_i32, %c0_i32_0 : i32, i32
  }
  func.func @transform_13(%arg0: i32, %arg1: i32, %arg2: i32) -> (i32, i32) {
    %c0_i32 = arith.constant 0 : i32
    %c0_i32_0 = arith.constant 0 : i32
    %c0_i32_1 = arith.constant 0 : i32
    return %c0_i32, %c0_i32_0 : i32, i32
  }
  func.func @transform_14(%arg0: i32, %arg1: i32, %arg2: i32) -> (i32, i32) {
    %c0_i32 = arith.constant 0 : i32
    %c0_i32_0 = arith.constant 0 : i32
    %c0_i32_1 = arith.constant 0 : i32
    return %c0_i32, %c0_i32_0 : i32, i32
  }
  func.func @transform_15(%arg0: i32, %arg1: i32, %arg2: i32) -> (i32, i32) {
    %c0_i32 = arith.constant 0 : i32
    %c0_i32_0 = arith.constant 0 : i32
    %c0_i32_1 = arith.constant 0 : i32
    return %c0_i32, %c0_i32_0 : i32, i32
  }
  func.func @transform_16(%arg0: i32, %arg1: i32, %arg2: i32) -> (i32, i32) {
    %c0_i32 = arith.constant 0 : i32
    %c0_i32_0 = arith.constant 0 : i32
    %c0_i32_1 = arith.constant 0 : i32
    return %c0_i32, %c0_i32_0 : i32, i32
  }
  func.func @transform_17(%arg0: i32, %arg1: i32, %arg2: i32) -> (i32, i32, i32) {
    %c0_i32 = arith.constant 0 : i32
    %c0_i32_0 = arith.constant 0 : i32
    return %arg0, %arg1, %c0_i32 : i32, i32, i32
  }
}

</mosaic_0001>

<bundles_post_ra>
// kernel: tpu_custom_call.1
= control target key start
LH: loop header
LB: loop body
LE: loop exit
PB: predicated region body
PF: predicated region fallthrough
CT: control target
= control target key end

     0   :  { %s4555_s0 = inlined_call_operand.hbm [shape: f32[2,8,32], index: 0, kind: input, shape index: {}]   ;;  %s4556_s1 = inlined_call_operand.hbm [shape: f32[2,8,256], index: 1, kind: input, shape index: {}]   ;;  %s4557_s2 = inlined_call_operand.hbm [shape: f32[2,8,256], index: 2, kind: input, shape index: {}]   ;;  %s4558_s3 = inlined_call_operand.vmem [shape: f32[2,8,3], index: 3, kind: input, shape index: {}]   ;;  %s4559_s4 = inlined_call_operand.vmem [shape: f32[2,8,3], index: 4, kind: input, shape index: {}]   ;;  %s4560_s5 = inlined_call_operand.hbm [shape: f32[2,4,8,8], index: 5, kind: input, shape index: {}]   ;;  %s4561_s6 = inlined_call_operand.vmem [shape: f32[2,8,1], index: 6, kind: input, shape index: {}]   ;;  %s4562_s7 = inlined_call_operand.vmem [shape: f32[2,8,1], index: 7, kind: input, shape index: {}]   ;;  %s4563_s8 = inlined_call_operand.vmem [shape: f32[1,256], index: 8, kind: input, shape index: {}]   ;;  %s4564_s9 = inlined_call_operand.hbm [shape: f32[4,256], index: 9, kind: input, shape index: {}]   ;;  %s4565_s10 = inlined_call_operand.vmem [shape: f32[256,128], index: 10, kind: input, shape index: {}]   ;;  %s4566_s11 = inlined_call_operand.hbm [shape: f32[1,128], index: 11, kind: input, shape index: {}]   ;;  %s4567_s12 = inlined_call_operand.hbm [shape: f32[32,128], index: 12, kind: input, shape index: {}]   ;;  %s4568_s13 = inlined_call_operand.hbm [shape: f32[128,128], index: 13, kind: input, shape index: {}]   ;;  %s4569_s14 = inlined_call_operand.vmem [shape: f32[1,128], index: 14, kind: input, shape index: {}]   ;;  %s4570_s15 = inlined_call_operand.vmem [shape: f32[128,32], index: 15, kind: input, shape index: {}]   ;;  %s4571_s16 = inlined_call_operand.vmem [shape: f32[1,32], index: 16, kind: input, shape index: {}]   ;;  %s4572_s17 = inlined_call_operand.hbm [shape: f32[2,8,32], index: 17, kind: output, shape index: {}]  }
   0x1   :  { %4586 = sst [smem:[#allocation37_spill]] %s4555_s0 }
   0x2   :  { %4587 = sst [smem:[#allocation38_spill]] %s4556_s1 }
   0x3   :  { %4588 = sst [smem:[#allocation39_spill]] %s4557_s2 }
   0x4   :  { %4589 = sst [smem:[#allocation40_spill]] %s4558_s3 }
   0x5   :  { %4590 = sst [smem:[#allocation41_spill]] %s4559_s4 }
   0x6   :  { %4591 = sst [smem:[#allocation42_spill]] %s4561_s6 }
   0x7   :  { %4592 = sst [smem:[#allocation43_spill]] %s4562_s7 }
   0x8   :  { %4593 = sst [smem:[#allocation44_spill]] %s4563_s8 }
   0x9   :  { %4594 = sst [smem:[#allocation45_spill]] %s4564_s9 }
   0xa   :  { %4595 = sst [smem:[#allocation46_spill]] %s4565_s10 }
   0xb   :  { %4596 = sst [smem:[#allocation47_spill]] %s4566_s11 }
   0xc   :  { %4597 = sst [smem:[#allocation48_spill]] %s4567_s12 }
   0xd   :  { %4598 = sst [smem:[#allocation49_spill]] %s4569_s14 }
   0xe   :  { %4599 = sst [smem:[#allocation50_spill]] %s4570_s15 }
   0xf   :  { %4600 = sst [smem:[#allocation51_spill]] %s4571_s16 }
  0x10   :  { %4601 = sst [smem:[#allocation52_spill]] %s4572_s17 }
  0x11   :  { %22 = vsyncpa [#allocation4], 0 }
  0x12   :  { %24 = vsyncpa [#allocation4 + $0x1], 0 }
  0x13   :  { %25 = vsyncpa [#allocation7], 0 }
  0x14   :  { %27 = vsyncpa [#allocation7 + $0x1], 0 }
  0x15   :  { %28 = vsyncpa [#allocation10], 0 }
  0x16   :  { %30 = vsyncpa [#allocation10 + $0x1], 0 }
  0x17   :  { %31 = vsyncpa [#allocation13], 0 }
  0x18   :  { %32 = vsyncpa [#allocation16], 0 }
  0x19   :  { %33 = vsyncpa [#allocation5], 0 }
  0x1a   :  { %35 = vsyncpa [#allocation5 + $0x1], 0  ;;  %s3474_s24 = smov 0   ;;  %s3476_s25 = smov 0  }
  0x1b   :  { %s3478_s26 = smov 0   ;;  %s3480_s27 = smov 0  }
  0x1c   :  { %s3482_s28 = smov 0   ;;  %s3484_s29 = smov 0  }
  0x1d LB: > { %4602 = sst [smem:[#allocation25_spill]] %s3345_s24  ;;  %s3505_s0 = sadd.s32 4294967295, %s3365_s29   ;;  %s3365_s29 = sphi %s3484_s29, %s41_s29   ;;  %s3361_s28 = sphi %s3482_s28, %s4663_s28   ;;  %s3357_s27 = sphi %s3480_s27, %s4662_s27   ;;  %s3353_s26 = sphi %s3478_s26, %s4658_s26   ;;  %s3349_s25 = sphi %s3476_s25, %s4661_s25   ;;  %s3345_s24 = sphi %s3474_s24, %s4660_s24  }
  0x1e   : > { %4603 = sst [smem:[#allocation26_spill]] %s3353_s26  ;;  %s2648_s30 = sadd.s32 4294967294, %s3365_s29  }
  0x1f   : > { %p82_p0 = scmp.ne.s32.totalorder %s3349_s25, %s3345_s24  ;;  %p4575_p1 = scmp.eq.s32.totalorder %s3505_s0, 0 }
  0x20   : > { %p501_p3 = scmp.eq.s32.totalorder %s2648_s30, 1  ;;  %p2649_p5 = scmp.ge.s32.totalorder %s3365_s29, 1 }
  0x21   : > { %p3514_p4 = por %p4575_p1, %p82_p0  ;;  %p508_p7 = scmp.lt.s32.totalorder %s3365_s29, 3 }
  0x22   : > { %p3519_p6 = por %p501_p3, %p82_p0  ;;  %s3367_s20 = smov [#allocation11]  }
  0x23   : > { %s4604_s18 = scalar_select %p3514_p4, 1, 0 }
  0x24   : > { %s4605_s19 = scalar_select %p3519_p6, 1, 0 }
  0x25   : > { %p3524_p8 = pnand %p2649_p5, %p508_p7  ;;  %s524_s21 = sshll.u32 %s3367_s20, 4  ;;  %s525_s21 = int_to_ptr.vmem [resolvable:$true] %s524_s21 }
  0x26   : > { %4606 = sst [smem:[#allocation27_spill]] %s4605_s19  ;;  %s3368_s22 = smov [#allocation12]  }
  0x27   : > { %p2893_p10 = pneg %p3524_p8  ;;  %s538_s23 = sshll.u32 %s3368_s22, 4  ;;  %s539_s23 = int_to_ptr.vmem [resolvable:$true] %s538_s23 }
  0x28   : > { %s3060_s19 = scalar_lea.vmem %s525_s21, 128  ;;  %p3068_p5 = scmp.lt.s32.totalorder %s525_s21, %s525_s21 }
  0x29   : > { %p3533_p11 = pnand %p2893_p10, %p4575_p1  ;;  %p3061_p13 = scmp.ne.s32.totalorder %s525_s21, %s3060_s19 }
  0x2a   : > { %p3069_p7 = scmp.lt.s32.totalorder %s3060_s19, %s3060_s19 }
  0x2b   : > { %p3051_p12 = pneg %p3533_p11 }
  0x2c   : > { %p3070_p9 = por %p3069_p7, %p3068_p5 }
  0x2d   : > { %p3063_p0 = pnand %p3061_p13, %p3051_p12 }
  0x2f   : > { %p3064_p3 = pneg %p3063_p0 }
  0x31   : > { %p3071_p2 = pnand %p3070_p9, %p3064_p3 }
  0x33   : > { %3074 = shalt.err (!%p3071_p2)
}
  0x34   : > { %s4609_s9 = sld [smem:[#allocation45_spill]]  ;;  %s3086_s24 = scalar_lea.vmem %s539_s23, 16 }
  0x35   : > { %p3087_p10 = scmp.ne.s32.totalorder %s539_s23, %s3086_s24  ;;  %s3093_s17 = scalar_lea.vmem %s539_s23, 32 }
  0x36   : > { %p3094_p13 = scmp.lt.s32.totalorder %s539_s23, %s539_s23  ;;  %p3095_p0 = scmp.lt.s32.totalorder %s3093_s17, %s3086_s24 }
  0x37   : > { %p3089_p1 = pnand %p3087_p10, %p3051_p12 }
  0x38   : > { %p3096_p4 = por %p3095_p0, %p3094_p13 }
  0x39   : > { %p3090_p6 = pneg %p3089_p1 }
  0x3a   : > { %2896 = dma.hbm_to_vmem [thread:$0]  (!%p3533_p11), %s4609_s9, 128, %s525_s21, [#allocation10]  }
  0x3b   : > { %p3097_p5 = pnand %p3096_p4, %p3090_p6 }
  0x3d   : > { %3100 = shalt.err (!%p3097_p5)
}
  0x3e   : > { %s4610_s11 = sld [smem:[#allocation47_spill]]  ;;  %s60_s17 = sadd.s32 1, %s3361_s28 }
  0x3f   : > { %s69_s24 = sadd.s32 1, %s3353_s26  ;;  %p62_p1 = scmp.ge.s32.totalorder %s60_s17, 2 }
  0x40   : > { %p76_p2 = scmp.ne.s32.totalorder %s3353_s26, %s3349_s25  ;;  %p77_p4 = scmp.eq.s32.totalorder %s3365_s29, 0 }
  0x41   : > { %p2927_p6 = scmp.lt.s32.totalorder %s3365_s29, 2  ;;  %s4665_s17 = smov (%p62_p1, %s60_s17), 0 }
  0x42   : > { %4611 = sst [smem:[#allocation28_spill]] %s4665_s17  ;;  %p78_p9 = por %p77_p4, %p76_p2 }
  0x43   : > { %p4612_p3 = scmp.eq.s32.totalorder %s3505_s0, 1  ;;  %s64_s21 = ssub.s32 %s3361_s28, %s4665_s17 }
  0x44   : > { %2899 = dma.hbm_to_vmem [thread:$0]  (!%p3533_p11), %s4610_s11, 16, %s539_s23, [#allocation13]  }
  0x45   : > { %p3565_p7 = por %p4612_p3, %p76_p2  ;;  %s3572_s23 = sand.u32 1, %s3353_s26  }
  0x46   : > { %p67_p10 = scmp.eq.s32.totalorder %s64_s21, 0  ;;  %p3574_p13 = pnand %p2927_p6, %p78_p9 }
  0x47   : > { %s4613_s16 = scalar_select %p3565_p7, 1, 0 }
  0x48   : > { %s4582_s22 = sand.u32 1, %s3365_s29   ;;  %s4583_s19 = sshll.u32 %s3572_s23, 4 }
  0x49   : > { %4614 = sst [smem:[#allocation29_spill]] %s4613_s16  ;;  %s2688_s11 = sshll.u32 %s3361_s28, 8 }
  0x4a   : > { %s3581_s9 = scalar_select %p67_p10, %s3353_s26, %s69_s24  }
  0x4b   : > { %s4617_s16 = sld [smem:[#allocation38_spill]]  ;;  %s607_s8 = scalar_lea.vmem [#allocation6], %s4583_s19 }
  0x4c   : > { %4616 = sst [smem:[#allocation30_spill]] %s3581_s9  ;;  %s617_s6 = sshll.u32 %s607_s8, 4  ;;  %s618_s6 = int_to_ptr.vmem [resolvable:$true] %s617_s6 }
  0x4d   : > { %s3591_s21 = scalar_lea.sflag [#allocation7], %s4582_s22  ;;  %p3103_p0 = pneg %p3574_p13 }
  0x4e   : > { %s3114_s7 = scalar_lea.vmem %s618_s6, 256  ;;  %s3369_s24 = smov [#allocation6]  }
  0x4f   : > { %p3115_p5 = scmp.ne.s32.totalorder %s618_s6, %s3114_s7  ;;  %s3119_s9 = sshll.u32 %s3369_s24, 4  ;;  %s3120_s9 = int_to_ptr.vmem [resolvable:$false] %s3119_s9 }
  0x50   : > { %s3121_s14 = scalar_lea.vmem %s3120_s9, 512  ;;  %p3122_p4 = scmp.lt.s32.totalorder %s618_s6, %s3120_s9 }
  0x51   : > { %s615_s17 = scalar_lea.hbm %s4617_s16, %s2688_s11  ;;  %p3117_p1 = pnand %p3115_p5, %p3103_p0 }
  0x52   : > { %p3123_p6 = scmp.lt.s32.totalorder %s3121_s14, %s3114_s7 }
  0x53   : > { %p3118_p2 = pneg %p3117_p1 }
  0x54   : > { %p3124_p9 = por %p3123_p6, %p3122_p4 }
  0x56   : > { %p3125_p3 = pnand %p3124_p9, %p3118_p2 }
  0x58   : > { %3128 = shalt.err (!%p3125_p3)
}
  0x59   : > { %2912 = dma.hbm_to_vmem [thread:$0]  (!%p3574_p13), %s615_s17, 256, %s618_s6, %s3591_s21  }
  0x5a   : > { %s4618_s2 = sld [smem:[#allocation39_spill]]  ;;  %s3370_s22 = smov [#allocation14]  }
  0x5b   : > { %s548_s19 = sshll.u32 %s3370_s22, 4  ;;  %s549_s19 = int_to_ptr.vmem [resolvable:$true] %s548_s19 }
  0x5c   : > { %s3140_s24 = scalar_lea.vmem %s549_s19, 512  ;;  %p3148_p2 = scmp.lt.s32.totalorder %s549_s19, %s549_s19 }
  0x5d   : > { %p3141_p10 = scmp.ne.s32.totalorder %s549_s19, %s3140_s24  ;;  %p3149_p4 = scmp.lt.s32.totalorder %s3140_s24, %s3140_s24 }
  0x5f   : > { %p3143_p5 = pnand %p3141_p10, %p3051_p12  ;;  %p3150_p6 = por %p3149_p4, %p3148_p2 }
  0x60   : > { %s3604_s16 = scalar_lea.hbm %s4618_s2, %s2688_s11 }
  0x61   : > { %p3144_p1 = pneg %p3143_p5 }
  0x63   : > { %p3151_p9 = pnand %p3150_p6, %p3144_p1 }
  0x65   : > { %3154 = shalt.err (!%p3151_p9)
}
  0x66   : > { %s3371_s6 = smov 128   ;;  %s3372_s7 = smov 8  }
  0x67   : > { %s4619_s12 = sld [smem:[#allocation48_spill]]  ;;  %s3373_s17 = smov [#allocation15]  }
  0x68   : > { %s561_s22 = sshll.u32 %s3373_s17, 4  ;;  %s2655_s14 = sshll.u32 %s3572_s23, 3  ;;  %s562_s22 = int_to_ptr.vmem [resolvable:$true] %s561_s22 }
  0x69   : > { %s3166_s8 = scalar_lea.vmem %s562_s22, 2048  ;;  %p3174_p1 = scmp.lt.s32.totalorder %s562_s22, %s562_s22 }
  0x6a   : > { %p3167_p3 = scmp.ne.s32.totalorder %s562_s22, %s3166_s8  ;;  %p3175_p2 = scmp.lt.s32.totalorder %s3166_s8, %s3166_s8 }
  0x6c   : > { %p3169_p10 = pnand %p3167_p3, %p3051_p12  ;;  %p3176_p4 = por %p3175_p2, %p3174_p1 }
  0x6d   : > { %2902 = dma.hbm_to_vmem [thread:$0]  (!%p3533_p11), %s4619_s12, 512, %s549_s19, [#allocation13], %s3371_s6, %s3371_s6, %s3372_s7  }
  0x6e   : > { %p3170_p5 = pneg %p3169_p10 }
  0x70   : > { %p3177_p6 = pnand %p3176_p4, %p3170_p5 }
  0x72   : > { %3180 = shalt.err (!%p3177_p6)
}
  0x73   : > { %2905 = dma.hbm_to_vmem [thread:$0]  (!%p3533_p11), %s4568_s13, 2048, %s562_s22, [#allocation16], %s3371_s6, %s3371_s6, %s3372_s7  }
  0x74   : > { %s2656_s24 = sshll.u32 %s3361_s28, 7  ;;  %s4620_s17 = sld [smem:[#allocation37_spill]] }
  0x75   : > { %s588_s2 = scalar_lea.vmem [#allocation3], %s2655_s14  ;;  %s4621_s30 = sshll.u32 %s3572_s23, 4 }
  0x76   : > { %s596_s12 = sshll.u32 %s588_s2, 4  ;;  %s628_s26 = scalar_lea.vmem [#allocation8], %s4621_s30  ;;  %s597_s12 = int_to_ptr.vmem [resolvable:$true] %s596_s12 }
  0x77   : > { %s638_s10 = sshll.u32 %s628_s26, 4  ;;  %s585_s4 = scalar_lea.sflag [#allocation4], %s3572_s23  ;;  %s639_s10 = int_to_ptr.vmem [resolvable:$true] %s638_s10 }
  0x78   : > { %s3194_s3 = scalar_lea.vmem %s597_s12, 128  ;;  %s3374_s19 = smov [#allocation3]  }
  0x79   : > { %p3195_p12 = scmp.ne.s32.totalorder %s597_s12, %s3194_s3  ;;  %s3199_s22 = sshll.u32 %s3374_s19, 4  ;;  %s3200_s22 = int_to_ptr.vmem [resolvable:$false] %s3199_s22 }
  0x7a   : > { %s594_s8 = scalar_lea.hbm %s4620_s17, %s2656_s24  ;;  %s3201_s15 = scalar_lea.vmem %s3200_s22, 256 }
  0x7b   : > { %p3197_p9 = pnand %p3195_p12, %p3103_p0  ;;  %p3202_p11 = scmp.lt.s32.totalorder %s597_s12, %s3200_s22 }
  0x7c   : > { %p3203_p10 = scmp.lt.s32.totalorder %s3201_s15, %s3194_s3 }
  0x7d   : > { %p3198_p3 = pneg %p3197_p9 }
  0x7e   : > { %p3204_p5 = por %p3203_p10, %p3202_p11 }
  0x80   : > { %p3205_p1 = pnand %p3204_p5, %p3198_p3 }
  0x82   : > { %3208 = shalt.err (!%p3205_p1)
}
  0x83   : > { %2909 = dma.hbm_to_vmem [thread:$0]  (!%p3574_p13), %s594_s8, 128, %s597_s12, %s585_s4  }
  0x84   : > { %s2663_s2 = sshll.u32 %s3572_s23, 5  ;;  %s3222_s26 = scalar_lea.vmem %s639_s10, 256 }
  0x85   : > { %p3223_p2 = scmp.ne.s32.totalorder %s639_s10, %s3222_s26  ;;  %s3375_s14 = smov [#allocation8]  }
  0x86   : > { %s3227_s24 = sshll.u32 %s3375_s14, 4  ;;  %s3228_s24 = int_to_ptr.vmem [resolvable:$false] %s3227_s24 }
  0x87   : > { %p3225_p4 = pnand %p3223_p2, %p3103_p0  ;;  %s3229_s3 = scalar_lea.vmem %s3228_s24, 512 }
  0x88   : > { %p3230_p12 = scmp.lt.s32.totalorder %s639_s10, %s3228_s24  ;;  %p3231_p9 = scmp.lt.s32.totalorder %s3229_s3, %s3222_s26 }
  0x89   : > { %p3226_p6 = pneg %p3225_p4 }
  0x8a   : > { %p3232_p3 = por %p3231_p9, %p3230_p12 }
  0x8c   : > { %p3233_p11 = pnand %p3232_p3, %p3226_p6 }
  0x8e   : > { %3236 = shalt.err (!%p3233_p11)
}
  0x8f   : > { %2915 = dma.hbm_to_vmem [thread:$0]  (!%p3574_p13), %s3604_s16, 256, %s639_s10, %s3591_s21  }
  0x90   : > { %s2690_s4 = sshll.u32 %s3361_s28, 9  ;;  %s669_s11 = scalar_lea.vmem [#allocation9], %s2663_s2 }
  0x91   : > { %s677_s9 = scalar_lea.hbm %s4560_s5, %s2690_s4  ;;  %s678_s17 = sshll.u32 %s669_s11, 4  ;;  %s679_s17 = int_to_ptr.vmem [resolvable:$true] %s678_s17 }
  0x92   : > { %s4622_s8 = sand.u32 1, %s3365_s29   ;;  %s3250_s19 = scalar_lea.vmem %s679_s17, 512 }
  0x93   : > { %s666_s30 = scalar_lea.sflag [#allocation10], %s4622_s8  ;;  %p3251_p10 = scmp.ne.s32.totalorder %s679_s17, %s3250_s19 }
  0x94   : > { %s3376_s22 = smov [#allocation9]  }
  0x95   : > { %p3253_p5 = pnand %p3251_p10, %p3103_p0  ;;  %s3255_s15 = sshll.u32 %s3376_s22, 4  ;;  %s3256_s15 = int_to_ptr.vmem [resolvable:$false] %s3255_s15 }
  0x96   : > { %s3257_s10 = scalar_lea.vmem %s3256_s15, 1024  ;;  %p3258_p2 = scmp.lt.s32.totalorder %s679_s17, %s3256_s15 }
  0x97   : > { %p3254_p1 = pneg %p3253_p5  ;;  %p3259_p4 = scmp.lt.s32.totalorder %s3257_s10, %s3250_s19 }
  0x99   : > { %p3260_p6 = por %p3259_p4, %p3258_p2 }
  0x9b   : > { %p3261_p12 = pnand %p3260_p6, %p3254_p1 }
  0x9d   : > { %3264 = shalt.err (!%p3261_p12)
}
  0x9e   : > { %2918 = dma.hbm_to_vmem [thread:$0]  (!%p3574_p13), %s677_s9, 512, %s679_s17, %s666_s30, %s3371_s6, %s3371_s6, %s3372_s7  }
  0x9f   : > { %710 = sbr.rel (%p3524_p8) target bundleno = 1204 (0x4b4), region = 88 }
  0xa4   : > { %s3666_s21 = sand.u32 1, %s3349_s25   ;;  %p4623_p0 = scmp.ne.s32.totalorder %s4604_s18, 0 }
  0xa5   : > { %s2667_s16 = sshll.u32 %s3666_s21, 3  ;;  %s713_s2 = scalar_lea.sflag [#allocation4], %s3666_s21 }
  0xa6   : > { %s3672_s26 = scalar_lea.vmem [#allocation3], %s2667_s16 }
  0xa7   : > { %3316 = dma.done.wait (%p4623_p0), %s713_s2, 128  }
  0xa8   : > { %3318 = vsyncadd (%p4623_p0), %s713_s2, 4294967168  ;;  %s721_s1 = sand.u32 1, %s3505_s0   ;;  %s2668_s20 = sshll.u32 %s3666_s21, 4 }
  0xa9   : > { %s722_s6 = scalar_lea.sflag [#allocation7], %s721_s1  ;;  %s3680_s7 = scalar_lea.vmem [#allocation6], %s2668_s20 }
  0xaa   : > { %3320 = dma.done.wait (%p4623_p0), %s722_s6, 512  }
  0xab   : > { %3322 = vsyncadd (%p4623_p0), %s722_s6, 4294966784  ;;  %s2670_s14 = sshll.u32 %s3666_s21, 5  ;;  %s3687_s24 = scalar_lea.vmem [#allocation8], %s2668_s20 }
  0xac   : > { %s740_s3 = scalar_lea.sflag [#allocation10], %s721_s1  ;;  %s3689_s4 = scalar_lea.vmem [#allocation9], %s2670_s14 }
  0xad   : > { %3324 = dma.done.wait (%p4623_p0), %s740_s3, 512  }
  0xae   : > { %3326 = vsyncadd (%p4623_p0), %s740_s3, 4294966784  ;;  %p4624_p8 = scmp.eq.s32.totalorder %s3505_s0, 0 }
  0xb0   : > { %3328 = dma.done.wait (%p4624_p8), [#allocation10], 128   ;;  %p4625_p13 = pmov %p4624_p8 }
  0xb1   : > { %p4626_p9 = pmov %p4624_p8 }
  0xb2   : > { %3330 = vsyncadd (%p4625_p13), [#allocation10], 4294967168 }
  0xb3   : > { %3332 = dma.done.wait (%p4626_p9), [#allocation13], 528   ;;  %p4627_p3 = pmov %p4624_p8 }
  0xb5   : > { %3334 = vsyncadd (%p4627_p3), [#allocation13], 4294966768  ;;  %p4628_p11 = pmov %p4627_p3 }
  0xb6   : > { %p4629_p10 = pmov %p4627_p3 }
  0xb7   : > { %3336 = dma.done.wait (%p4628_p11), [#allocation16], 2048  }
  0xb8   : > { %3338 = vsyncadd (%p4629_p10), [#allocation16], 4294965248  ;;  %p853_p5 = scmp.lt.s32.totalorder %s3357_s27, 1  ;;  %v898_v0 = vlaneseq  ;;  %v3377_v1 = vmov 1966171168   ;;  %s4630_s11 = sld [smem:[#allocation40_spill]] }
  0xb9   : > { %v896_v2 = vunpack.c.l.s4 %v3377_v1  ;;  %s4631_s30 = sld [smem:[#allocation41_spill]]  ;;  %s3378_s22 = smov 127   ;;  %v3755_v31 = vld [vmem:[%s3689_s4 + $0x10] sm:$0xff]  ;;  %v3379_v32 = vmov 0   ;;  %v3768_v37 = vld [vmem:[%s3689_s4] sm:$0xff]  ;;  %v3771_v38 = vld [vmem:[%s3689_s4 + $0x8] sm:$0xff] }
  0xba   : > { %s854_s18 = scalar_select %p853_p5, %s3357_s27, 1  ;;  %v3709_v3 = vshrl.u32 %v898_v0, 7  ;;  %2993 = vset.pattern.permute.xlu0 %v3379_v32  ;;  %2994 = vset.pattern.permute.xlu1 %v3379_v32  ;;  %v3789_v46 = vld [vmem:[%s3689_s4 + $0x18] sm:$0xff]  ;;  %v3797_v49 = vld [vmem:[#allocation11] sm:$0xff]  ;;  %vm3382_vm0 = vmmov 0   ;;  %vm2075_vm1 = vcmask 1041409  }
  0xbb   : > { %v897_v4 = vunpack.c.0.s8 %v896_v2  ;;  %s3380_s15 = smov 126   ;;  %s4632_s1 = sld [smem:[#allocation46_spill]]  ;;  %vm2077_vm2 = vcmask 1042434   ;;  %vm2079_vm3 = vcmask 1043459   ;;  %vm2081_vm4 = vcmask 1044484  }
  0xbc   : > { %s3711_s12 = sshll.u32 %s854_s18, 3  ;;  %v3726_v8 = vsub.s32 0, %v3709_v3  ;;  %v3750_v28 = vsub.s32 4, %v3709_v3  ;;  %v3763_v35 = vsub.s32 5, %v3709_v3  ;;  %v3780_v41 = vsub.s32 6, %v3709_v3  ;;  %s4633_s0 = sld [smem:[#allocation43_spill]] }
  0xbd   : > { %v3718_v5 = vsub.s32 %v897_v4, %v3709_v3  ;;  %v3800_v50 = vsub.s32 2, %v3709_v3  ;;  %v3828_v62 = vsub.s32 7, %v3709_v3  ;;  %v3836_v1 = vsub.s32 3, %v3709_v3  ;;  %s4635_s10 = sld [smem:[#allocation44_spill]] }
  0xbe   : > { %s859_s17 = scalar_lea.vmem %s4630_s11, %s3711_s12  ;;  %v1560_v36 = vrot.slane %v3755_v31, %v3750_v28  ;;  %v1354_v39 = vrot.slane %v3768_v37, %v3763_v35  ;;  %v1461_v40 = vrot.slane %v3771_v38, %v3763_v35  ;;  %v1361_v47 = vrot.slane %v3768_v37, %v3780_v41  ;;  %s4648_s20 = sld [smem:[#allocation50_spill]] }
  0xbf   : > { %v890_v6 = vld [vmem:[%s859_s17] sm:$0xff]  ;;  %s866_s19 = scalar_lea.vmem %s4631_s30, %s3711_s12  ;;  %v1666_v48 = vrot.slane %v3789_v46, %v3750_v28  ;;  %v1592_v51 = vrot.slane %v3797_v49, %v3780_v41  ;;  %v1468_v57 = vrot.slane %v3771_v38, %v3780_v41  ;;  %v1567_v61 = vrot.slane %v3755_v31, %v3763_v35  ;;  %s4652_s6 = sld [smem:[#allocation52_spill]] }
  0xc0   : > { %v901_v7 = vrot.slane %v890_v6, %v3718_v5  ;;  %v894_v9 = vcombine.high %v890_v6, %v890_v6  ;;  %v3730_v13 = vld [vmem:[%s866_s19] sm:$0xff]  ;;  %v1368_v2 = vrot.slane %v3768_v37, %v3828_v62  ;;  %v1698_v4 = vrot.slane %v3797_v49, %v3828_v62 }
  0xc1   : > { %v3811_v56 = vrot.slane %v1592_v51, %v3800_v50  ;;  %v1546_v32 = vrot.slane %v3755_v31, %v3800_v50  ;;  %vm2083_vm5 = vcmask 1045509   ;;  %vm2085_vm6 = vcmask 1046534  }
  0xc2   : > { %v917_v10 = vrot.slane %v901_v7, %v3718_v5  ;;  %v909_v11 = vcombine.high %v901_v7, %v901_v7  ;;  %v908_v12 = vrot.slane %v894_v9, %v3718_v5  ;;  %v3845_v6 = vrot.slane %v1698_v4, %v3836_v1  ;;  %s880_s8 = scalar_lea.vmem %s4633_s0, %s3711_s12 }
  0xc3   : > { %v1475_v7 = vrot.slane %v3771_v38, %v3828_v62  ;;  %vm2087_vm7 = vcmask 1047559   ;;  %vm2194_vm8 = vcmask 261120  }
  0xc4   : > { %v946_v14 = vrot.slane %v917_v10, %v3726_v8  ;;  %v931_v15 = vrot.slane %v909_v11, %v3718_v5  ;;  %v939_v16 = vcombine.high %v917_v10, %v917_v10  ;;  %v924_v17 = vrot.slane %v908_v12, %v3718_v5 }
  0xc5   : > { %v910_v24 = vcombine.high %v908_v12, %v908_v12  ;;  %v3854_v10 = vsub.s32 1, %v3709_v3  ;;  %v1673_v11 = vrot.slane %v3789_v46, %v3763_v35  ;;  %v1581_v12 = vrot.slane %v3755_v31, %v3828_v62 }
  0xc6   : > { %v983_v18 = vsub.f32 %v946_v14, %v3730_v13  ;;  %v950_v19 = vrot.slane %v931_v15, %v3726_v8  ;;  %v954_v20 = vrot.slane %v939_v16, %v3726_v8  ;;  %v962_v23 = vrot.slane %v924_v17, %v3726_v8 }
  0xc7   : > { %v941_v27 = vcombine.high %v931_v15, %v931_v15  ;;  %v938_v30 = vrot.slane %v910_v24, %v3718_v5  ;;  %v940_v45 = vcombine.high %v924_v17, %v924_v17  ;;  %v1574_v14 = vrot.slane %v3755_v31, %v3780_v41 }
  0xc8   : > { %v3738_v21 = vmul.f32 %v983_v18, %v983_v18  ;;  %v984_v22 = vsub.f32 %v950_v19, %v3730_v13  ;;  %v985_v26 = vsub.f32 %v954_v20, %v3730_v13  ;;  %v987_v29 = vsub.f32 %v962_v23, %v3730_v13 }
  0xc9   : > { %v958_v34 = vrot.slane %v941_v27, %v3726_v8  ;;  %v966_v44 = vrot.slane %v938_v30, %v3726_v8  ;;  %v970_v54 = vrot.slane %v940_v45, %v3726_v8  ;;  %v942_v55 = vcombine.high %v938_v30, %v938_v30 }
  0xca   : > { %1015 = vrot.lane.b32.xlu0 %v3738_v21, %s3378_s22  ;;  %v3744_v25 = vmul.f32 %v984_v22, %v984_v22  ;;  %v3759_v33 = vmul.f32 %v985_v26, %v985_v26  ;;  %v3784_v42 = vmul.f32 %v987_v29, %v987_v29  ;;  %v1319_v3 = vrot.slane %v3768_v37, %v3726_v8 }
  0xcb   : > { %v986_v43 = vsub.f32 %v958_v34, %v3730_v13  ;;  %v988_v53 = vsub.f32 %v966_v44, %v3730_v13  ;;  %v989_v59 = vsub.f32 %v970_v54, %v3730_v13  ;;  %v974_v60 = vrot.slane %v942_v55, %v3726_v8 }
  0xcc   : > { %1017 = vrot.lane.b32.xlu1 %v3744_v25, %s3378_s22  ;;  %v1638_v15 = vrot.slane %v3789_v46, %v3726_v8  ;;  %v1680_v16 = vrot.slane %v3789_v46, %v3780_v41  ;;  %v1426_v17 = vrot.slane %v3771_v38, %v3726_v8  ;;  %v1687_v18 = vrot.slane %v3789_v46, %v3828_v62 }
  0xcd   : > { %v3806_v52 = vmul.f32 %v986_v43, %v986_v43  ;;  %v3819_v58 = vmul.f32 %v988_v53, %v988_v53  ;;  %v3832_v63 = vmul.f32 %v989_v59, %v989_v59  ;;  %v990_v0 = vsub.f32 %v974_v60, %v3730_v13 }
  0xce   : > { %1047 = vrot.lane.b32.xlu0 %v3738_v21, %s3380_s15  ;;  %v1326_v13 = vrot.slane %v3768_v37, %v3854_v10  ;;  %v1539_v19 = vrot.slane %v3755_v31, %v3854_v10  ;;  %v1532_v20 = vrot.slane %v3755_v31, %v3726_v8  ;;  %v1440_v22 = vrot.slane %v3771_v38, %v3800_v50 }
  0xcf   : > { %v3851_v9 = vmul.f32 %v990_v0, %v990_v0  ;;  %v1433_v23 = vrot.slane %v3771_v38, %v3854_v10  ;;  %v1340_v24 = vrot.slane %v3768_v37, %v3836_v1  ;;  %v1333_v26 = vrot.slane %v3768_v37, %v3800_v50  ;;  %v1852_v0 = vld [vmem:[%s4632_s1 + $0xf8] sm:$0xff] }
  0xd0   : > { %1049 = vrot.lane.b32.xlu1 %v3744_v25, %s3380_s15  ;;  %v1652_v27 = vrot.slane %v3789_v46, %v3800_v50  ;;  %v1645_v29 = vrot.slane %v3789_v46, %v3854_v10  ;;  %v1553_v30 = vrot.slane %v3755_v31, %v3836_v1  ;;  %v1454_v34 = vrot.slane %v3771_v38, %v3750_v28 }
  0xd1   : > { %v1447_v43 = vrot.slane %v3771_v38, %v3836_v1  ;;  %v1347_v44 = vrot.slane %v3768_v37, %v3750_v28  ;;  %v1659_v45 = vrot.slane %v3789_v46, %v3836_v1  ;;  %2691 = vmatprep.subr.mxu0 %v1852_v0  ;;  %v1828_v0 = vld [vmem:[%s4632_s1 + $0x38] sm:$0xff]  ;;  %v1821_v37 = vld [vmem:[%s4632_s1] sm:$0xff] }
  0xd2   : > { %1019 = vrot.lane.b32.xlu0 %v3759_v33, %s3378_s22  ;;  %v892_v38 = vld [vmem:[%s880_s8] sm:$0xff]  ;;  %s4649_s8 = sld [smem:[#allocation49_spill]] }
  0xd4   : > { %1051 = vrot.lane.b32.xlu1 %v3759_v33, %s3380_s15 }
  0xd6   : > { %1023 = vrot.lane.b32.xlu0 %v3784_v42, %s3378_s22 }
  0xd8   : > { %1055 = vrot.lane.b32.xlu1 %v3784_v42, %s3380_s15 }
  0xda   : > { %1021 = vrot.lane.b32.xlu0 %v3806_v52, %s3378_s22 }
  0xdc   : > { %1053 = vrot.lane.b32.xlu1 %v3806_v52, %s3380_s15 }
  0xde   : > { %1025 = vrot.lane.b32.xlu0 %v3819_v58, %s3378_s22 }
  0xe0   : > { %1057 = vrot.lane.b32.xlu1 %v3819_v58, %s3380_s15 }
  0xe2   : > { %1027 = vrot.lane.b32.xlu0 %v3832_v63, %s3378_s22 }
  0xe4   : > { %1059 = vrot.lane.b32.xlu1 %v3832_v63, %s3380_s15 }
  0xe6   : > { %1029 = vrot.lane.b32.xlu0 %v3851_v9, %s3378_s22  ;;  %s4634_s22 = sld [smem:[#allocation42_spill]] }
  0xe8   : > { %1061 = vrot.lane.b32.xlu1 %v3851_v9, %s3380_s15 }
  0xea   : > { %1328 = vbcast.lane.b32.xlu0 %v1326_v13, 256 }
  0xec   : > { %1321 = vbcast.lane.b32.xlu1 %v1319_v3, 256  ;;  %v1836_v3 = vld [vmem:[%s4632_s1 + $0x78] sm:$0xff]  ;;  %s873_s15 = scalar_lea.vmem %s4634_s22, %s3711_s12  ;;  %s852_s12 = scalar_lea.vmem [#allocation17], %s2667_s16 }
  0xed   : > { %2692 = vmatpush3.msra.mxu0 %v1836_v3 }
  0xee   : > { %1640 = vbcast.lane.b32.xlu0 %v1638_v15, 256 }
  0xf0   : > { %1428 = vbcast.lane.b32.xlu1 %v1426_v17, 256  ;;  %v1835_v17 = vld [vmem:[%s4632_s1 + $0x70] sm:$0xff] }
  0xf2   : > { %1541 = vbcast.lane.b32.xlu0 %v1539_v19, 256 }
  0xf4   : > { %1534 = vbcast.lane.b32.xlu1 %v1532_v20, 256  ;;  %v1850_v20 = vld [vmem:[%s4632_s1 + $0xe8] sm:$0xff] }
  0xf6   : > { %1442 = vbcast.lane.b32.xlu0 %v1440_v22, 256 }
  0xf8   : > { %1435 = vbcast.lane.b32.xlu1 %v1433_v23, 256  ;;  %v1849_v23 = vld [vmem:[%s4632_s1 + $0xe0] sm:$0xff] }
  0xfa   : > { %1342 = vbcast.lane.b32.xlu0 %v1340_v24, 256 }
  0xfc   : > { %1335 = vbcast.lane.b32.xlu1 %v1333_v26, 256 }
  0xfe   : > { %1654 = vbcast.lane.b32.xlu0 %v1652_v27, 256  ;;  %v1848_v27 = vld [vmem:[%s4632_s1 + $0xd8] sm:$0xff] }
 0x100   : > { %1647 = vbcast.lane.b32.xlu1 %v1645_v29, 256 }
 0x102   : > { %1555 = vbcast.lane.b32.xlu0 %v1553_v30, 256  ;;  %v1832_v30 = vld [vmem:[%s4632_s1 + $0x58] sm:$0xff] }
 0x104   : > { %1548 = vbcast.lane.b32.xlu1 %v1546_v32, 256  ;;  %v1847_v32 = vld [vmem:[%s4632_s1 + $0xd0] sm:$0xff] }
 0x106   : > { %1456 = vbcast.lane.b32.xlu0 %v1454_v34, 256 }
 0x108   : > { %1449 = vbcast.lane.b32.xlu1 %v1447_v43, 256 }
 0x10c   : > { %1349 = vbcast.lane.b32.xlu1 %v1347_v44, 256  ;;  %v1846_v44 = vld [vmem:[%s4632_s1 + $0xc8] sm:$0xff] }
 0x110   : > { %1661 = vbcast.lane.b32.xlu1 %v1659_v45, 256 }
 0x13c   : > { %v1016_v51 = vpop.permute.xlu0 %1015 }
 0x13d   : > { %v1039_v54 = vadd.f32 %v1016_v51, %v3738_v21  ;;  %v1851_v21 = vld [vmem:[%s4632_s1 + $0xf0] sm:$0xff] }
 0x13e   : > { %v1018_v53 = vpop.permute.xlu1 %1017  ;;  %2693 = vmatprep.subr.mxu0 %v1851_v21 }
 0x13f   : > { %v1040_v59 = vadd.f32 %v1018_v53, %v3744_v25  ;;  %2694 = vmatpush3.msra.mxu0 %v1835_v17 }
 0x140   : > { %v1048_v55 = vpop.permute.xlu0 %1047  ;;  %2695 = vmatprep.subr.mxu0 %v1850_v20 }
 0x141   : > { %v1071_v60 = vadd.f32 %v1048_v55, %v1039_v54  ;;  %v1829_v55 = vld [vmem:[%s4632_s1 + $0x40] sm:$0xff] }
 0x142   : > { %v1050_v4 = vpop.permute.xlu1 %1049 }
 0x143   : > { %v1072_v13 = vadd.f32 %v1050_v4, %v1040_v59  ;;  %1235 = vperm.xlu0 %2993, %v1071_v60   ;;  %v1844_v60 = vld [vmem:[%s4632_s1 + $0xb8] sm:$0xff] }
 0x144   : > { %v1020_v15 = vpop.permute.xlu0 %1019 }
 0x145   : > { %v1041_v25 = vadd.f32 %v1020_v15, %v3759_v33  ;;  %1240 = vperm.xlu1 %2994, %v1072_v13   ;;  %v1834_v33 = vld [vmem:[%s4632_s1 + $0x68] sm:$0xff]  ;;  %v1827_v15 = vld [vmem:[%s4632_s1 + $0x30] sm:$0xff] }
 0x146   : > { %v1052_v19 = vpop.permute.xlu1 %1051  ;;  %2696 = vmatpush3.msra.mxu0 %v1834_v33  ;;  %v1825_v33 = vld [vmem:[%s4632_s1 + $0x20] sm:$0xff] }
 0x147   : > { %1356 = vbcast.lane.b32.xlu0 %v1354_v39, 256  ;;  %v1073_v24 = vadd.f32 %v1052_v19, %v1041_v25  ;;  %2697 = vmatprep.subr.mxu0 %v1849_v23  ;;  %v1833_v39 = vld [vmem:[%s4632_s1 + $0x60] sm:$0xff]  ;;  %v1824_v23 = vld [vmem:[%s4632_s1 + $0x18] sm:$0xff] }
 0x148   : > { %v1024_v22 = vpop.permute.xlu0 %1023  ;;  %2698 = vmatpush3.msra.mxu0 %v1833_v39  ;;  %v1841_v19 = vld [vmem:[%s4632_s1 + $0xa0] sm:$0xff]  ;;  %v1822_v39 = vld [vmem:[%s4632_s1 + $0x8] sm:$0xff] }
 0x149   : > { %1562 = vbcast.lane.b32.xlu1 %v1560_v36, 256  ;;  %v1043_v29 = vadd.f32 %v1024_v22, %v3784_v42  ;;  %2699 = vmatprep.subr.mxu0 %v1848_v27  ;;  %v1831_v42 = vld [vmem:[%s4632_s1 + $0x50] sm:$0xff]  ;;  %v1840_v22 = vld [vmem:[%s4632_s1 + $0x98] sm:$0xff] }
 0x14a   : > { %v1056_v26 = vpop.permute.xlu1 %1055  ;;  %2700 = vmatpush3.msra.mxu0 %v1832_v30 }
 0x14b   : > { %1245 = vperm.xlu0 %2993, %v1073_v24   ;;  %2701 = vmatprep.subr.mxu0 %v1847_v32  ;;  %v1075_v45 = vadd.f32 %v1056_v26, %v1043_v29  ;;  %v1839_v24 = vld [vmem:[%s4632_s1 + $0x90] sm:$0xff]  ;;  %v1837_v26 = vld [vmem:[%s4632_s1 + $0x80] sm:$0xff] }
 0x14c   : > { %v1022_v36 = vpop.permute.xlu0 %1021  ;;  %2702 = vmatpush3.msra.mxu0 %v1831_v42 }
 0x14d   : > { %v1042_v34 = vadd.f32 %v1022_v36, %v3806_v52  ;;  %1463 = vbcast.lane.b32.xlu1 %v1461_v40, 256  ;;  %2703 = vmatprep.subr.mxu0 %v1846_v44  ;;  %v1830_v52 = vld [vmem:[%s4632_s1 + $0x48] sm:$0xff]  ;;  %v1845_v40 = vld [vmem:[%s4632_s1 + $0xc0] sm:$0xff]  ;;  %v1486_v44 = vrot.slane %v3797_v49, %v3763_v35 }
 0x14e   : > { %v1054_v43 = vpop.permute.xlu1 %1053  ;;  %2704 = vmatpush3.msra.mxu0 %v1830_v52  ;;  %v2998_v36 = vld [vmem:[%s3680_s7 + $0x4] ss:$8 sps:$4 sm:$0xff]   ;;  %v1694_v52 = vrot.slane %v3797_v49, %v3836_v1 }
 0x14f   : > { %v1074_v51 = vadd.f32 %v1054_v43, %v1042_v34  ;;  %2705 = vmatprep.subr.mxu0 %v1845_v40  ;;  %v1380_v34 = vrot.slane %v3797_v49, %v3750_v28  ;;  %v1102_v43 = vrot.slane %v2998_v36, %v3718_v5  ;;  %v1588_v28 = vrot.slane %v3797_v49, %v3800_v50 }
 0x150   : > { %v1026_v53 = vpop.permute.xlu0 %1025  ;;  %2706 = vmatpush3.msra.mxu0 %v1829_v55 }
 0x151   : > { %v1044_v54 = vadd.f32 %v1026_v53, %v3819_v58  ;;  %1255 = vperm.xlu1 %2994, %v1075_v45   ;;  %1250 = vperm.xlu0 %2993, %v1074_v51   ;;  %v1843_v58 = vld [vmem:[%s4632_s1 + $0xb0] sm:$0xff]  ;;  %v1376_v45 = vrot.slane %v3797_v49, %v3726_v8  ;;  %v1482_v51 = vrot.slane %v3797_v49, %v3854_v10 }
 0x152   : > { %v1058_v59 = vpop.permute.xlu1 %1057  ;;  %2707 = vmatprep.subr.mxu0 %v1844_v60  ;;  %v1104_v40 = vcombine.high %v1102_v43, %v1102_v43  ;;  %v4106_v55 = vrot.slane %v1380_v34, %v3726_v8 }
 0x153   : > { %v1076_v13 = vadd.f32 %v1058_v59, %v1044_v54  ;;  %2708 = vmatpush3.msra.mxu0 %v1828_v0  ;;  %v1079_v59 = vld [vmem:[%s4635_s10] sm:$0x3]  ;;  %v1118_v0 = vrot.slane %v1102_v43, %v3718_v5  ;;  %v4119_v49 = vrot.slane %v1376_v45, %v3726_v8  ;;  %s2391_s10 = sshll.u32 %s852_s12, 4  ;;  %s2392_s10 = int_to_ptr.vmem [resolvable:$true] %s2391_s10 }
 0x154   : > { %v1028_v4 = vpop.permute.xlu0 %1027  ;;  %2709 = vmatprep.subr.mxu0 %v1843_v58  ;;  %v4122_v58 = vrot.slane %v1482_v51, %v3854_v10  ;;  %s3265_s3 = scalar_lea.vmem %s2392_s10, 128 }
 0x155   : > { %v1045_v3 = vadd.f32 %v1028_v4, %v3832_v63  ;;  %1363 = vbcast.lane.b32.xlu1 %v1361_v47, 256  ;;  %1668 = vbcast.lane.b32.xlu0 %v1666_v48, 256  ;;  %v1842_v63 = vld [vmem:[%s4632_s1 + $0xa8] sm:$0xff]  ;;  %v4116_v4 = vrot.slane %v1486_v44, %v3854_v10  ;;  %p3266_p1 = scmp.ne.s32.totalorder %s2392_s10, %s3265_s3 }
 0x156   : > { %v1060_v21 = vpop.permute.xlu1 %1059  ;;  %2710 = vmatpush3.msra.mxu0 %v1827_v15  ;;  %v1826_v47 = vld [vmem:[%s4632_s1 + $0x28] sm:$0xff] }
 0x157   : > { %v1077_v25 = vadd.f32 %v1060_v21, %v1045_v3  ;;  %2711 = vmatprep.subr.mxu0 %v1842_v63  ;;  %v4125_v3 = vrot.slane %v1694_v52, %v3836_v1  ;;  %v1134_v21 = vcombine.high %v1118_v0, %v1118_v0  ;;  %v4129_v63 = vrot.slane %v1588_v28, %v3800_v50  ;;  %v888_v1 = vld [vmem:[%s3687_s24] sm:$0xff]  ;;  %p3267_p2 = pnand %p3266_p1, %p3565_p7 }
 0x158   : > { %v1030_v17 = vpop.permute.xlu0 %1029  ;;  %2712 = vmatpush3.msra.mxu0 %v1826_v47 }
 0x159   : > { %1265 = vperm.xlu1 %2994, %v1077_v25   ;;  %1260 = vperm.xlu0 %2993, %v1076_v13   ;;  %v1046_v48 = vadd.f32 %v1030_v17, %v3851_v9  ;;  %v1132_v25 = vrot.slane %v1104_v40, %v3718_v5  ;;  %v4132_v17 = vrot.slane %v1079_v59, %v3726_v8  ;;  %p3268_p4 = pneg %p3267_p2 }
 0x15a   : > { %v1062_v20 = vpop.permute.xlu1 %1061  ;;  %2713 = vmatprep.subr.mxu0 %v1841_v19 }
 0x15b   : > { %v1078_v9 = vadd.f32 %v1062_v20, %v1046_v48  ;;  %2714 = vmatpush3.msra.mxu0 %v1825_v33  ;;  %v4139_v20 = vrot.slane %v1079_v59, %v3854_v10  ;;  %v889_v33 = vld [vmem:[%s3687_s24 + $0x8] sm:$0xff]  ;;  %v1136_v50 = vcombine.high %v1132_v25, %v1132_v25  ;;  %v1184_v36 = vrot.slane %v1132_v25, %v3854_v10 }
 0x15c   : > { %2715 = vmatprep.subr.mxu0 %v1840_v22 }
 0x15d   : > { %1470 = vbcast.lane.b32.xlu1 %v1468_v57, 256  ;;  %1569 = vbcast.lane.b32.xlu0 %v1567_v61, 256  ;;  %v1823_v57 = vld [vmem:[%s4632_s1 + $0x10] sm:$0xff]  ;;  %v1838_v61 = vld [vmem:[%s4632_s1 + $0x88] sm:$0xff]  ;;  %v1196_v43 = vrot.slane %v1136_v50, %v3726_v8  ;;  %v1200_v44 = vrot.slane %v1136_v50, %v3854_v10 }
 0x15e   : > { %2716 = vmatpush3.msra.mxu0 %v1824_v23  ;;  %v4062_v31 = vpop.permute.xlu1 %1321 }
 0x15f   : > { %2717 = vmatprep.subr.mxu0 %v1839_v24  ;;  %v1172_v24 = vrot.slane %v1118_v0, %v3726_v8 }
 0x160   : > { %2718 = vmatpush3.msra.mxu0 %v1823_v57  ;;  %v1176_v57 = vrot.slane %v1118_v0, %v3854_v10 }
 0x161   : > { %1370 = vbcast.lane.b32.xlu1 %v1368_v2, 256  ;;  %1270 = vperm.xlu0 %2993, %v1078_v9   ;;  %v2096_v2 = vld [vmem:[%s873_s15] sm:$0xff]  ;;  %v4163_v52 = vadd.f32 %v1172_v24, %v888_v1  ;;  %s4651_s15 = sld [smem:[#allocation51_spill]] }
 0x162   : > { %2719 = vmatprep.subr.mxu0 %v1838_v61  ;;  %v4165_v40 = vadd.f32 %v1176_v57, %v889_v33 }
 0x163   : > { %2720 = vmatpush3.msra.mxu0 %v1822_v39 }
 0x164   : > { %2721 = vmatprep.subr.mxu0 %v1837_v26 }
 0x165   : > { %1477 = vbcast.lane.b32.xlu1 %v1475_v7, 256  ;;  %1675 = vbcast.lane.b32.xlu0 %v1673_v11, 256  ;;  %v4064_v7 = vpop.permute.xlu1 %1428  ;;  %v4066_v11 = vpop.permute.xlu0 %1328 }
 0x166   : > { %2722 = vmatpush3.msra.mxu0 %v1821_v37  ;;  %v1188_v37 = vrot.slane %v1134_v21, %v3726_v8 }
 0x169   : > { %1583 = vbcast.lane.b32.xlu1 %v1581_v12, 256  ;;  %1576 = vbcast.lane.b32.xlu0 %v1574_v14, 256  ;;  %v4068_v41 = vpop.permute.xlu1 %1534  ;;  %v4070_v12 = vpop.permute.xlu0 %1640 }
 0x16a   : > { %v1709_v50 = vmul.f32 %v4125_v3, %v4070_v12 }
 0x16d   : > { %2008 = vperm.xlu1 %2994, %v892_v38   ;;  %1682 = vbcast.lane.b32.xlu0 %v1680_v16, 256  ;;  %v4072_v14 = vpop.permute.xlu1 %1435  ;;  %v4074_v16 = vpop.permute.xlu0 %1541  ;;  %v1192_v38 = vrot.slane %v1134_v21, %v3854_v10  ;;  %v1391_v21 = vmul.f32 %v4119_v49, %v4062_v31 }
 0x16f   : > { %v4173_v0 = vadd.f32 %v1192_v38, %v889_v33 }
 0x171   : > { %1689 = vbcast.lane.b32.xlu0 %v1687_v18, 256  ;;  %v4076_v27 = vpop.permute.xlu1 %1335  ;;  %v4078_v46 = vpop.permute.xlu0 %1442  ;;  %v2996_v18 = vld [vmem:[%s3680_s7] ss:$8 sps:$4 sm:$0xff]   ;;  %s2685_s7 = sshll.u32 %s3357_s27, 7  ;;  %s3383_s27 = smov [#allocation17]  }
 0x172   : > { %v1095_v30 = vrot.slane %v2996_v18, %v3718_v5  ;;  %s2389_s14 = scalar_lea.hbm %s4652_s6, %s2685_s7  ;;  %s3269_s16 = sshll.u32 %s3383_s27, 4  ;;  %s3270_s16 = int_to_ptr.vmem [resolvable:$false] %s3269_s16 }
 0x173   : > { %s3271_s4 = scalar_lea.vmem %s3270_s16, 256  ;;  %p3272_p6 = scmp.lt.s32.totalorder %s2392_s10, %s3270_s16 }
 0x174   : > { %v1103_v42 = vcombine.high %v1095_v30, %v1095_v30  ;;  %v1111_v54 = vrot.slane %v1095_v30, %v3718_v5  ;;  %v1180_v30 = vrot.slane %v1132_v25, %v3726_v8  ;;  %v1392_v25 = vmul.f32 %v4106_v55, %v4062_v31  ;;  %p3273_p12 = scmp.lt.s32.totalorder %s3271_s4, %s3265_s3 }
 0x175   : > { %2100 = vperm.xlu0 %2993, %v2096_v2   ;;  %v4080_v62 = vpop.permute.xlu1 %1647  ;;  %v4083_v29 = vpop.permute.xlu0 %1342  ;;  %v1603_v31 = vmul.f32 %v4129_v63, %v4068_v41 }
 0x176   : > { %v1125_v60 = vrot.slane %v1103_v42, %v3718_v5  ;;  %v1133_v13 = vcombine.high %v1111_v54, %v1111_v54  ;;  %v1140_v47 = vrot.slane %v1111_v54, %v3726_v8  ;;  %v1144_v48 = vrot.slane %v1111_v54, %v3854_v10  ;;  %p3274_p0 = por %p3273_p12, %p3272_p6 }
 0x178   : > { %v1135_v15 = vcombine.high %v1125_v60, %v1125_v60  ;;  %v1148_v22 = vrot.slane %v1125_v60, %v3726_v8  ;;  %v1152_v5 = vrot.slane %v1125_v60, %v3854_v10  ;;  %v1156_v9 = vrot.slane %v1133_v13, %v3726_v8  ;;  %p3275_p8 = pnand %p3274_p0, %p3268_p4 }
 0x179   : > { %v4087_v32 = vpop.permute.xlu1 %1548  ;;  %v4100_v53 = vpop.permute.xlu0 %1654  ;;  %v1160_v23 = vrot.slane %v1133_v13, %v3854_v10  ;;  %v1217_v2 = vadd.f32 %v1140_v47, %v888_v1  ;;  %v1218_v18 = vadd.f32 %v1144_v48, %v889_v33  ;;  %v4171_v60 = vadd.f32 %v1188_v37, %v888_v1 }
 0x17a   : > { %v1164_v39 = vrot.slane %v1135_v15, %v3726_v8  ;;  %v1168_v26 = vrot.slane %v1135_v15, %v3854_v10  ;;  %v1219_v34 = vadd.f32 %v1148_v22, %v888_v1  ;;  %v1220_v42 = vadd.f32 %v1152_v5, %v889_v33 }
 0x17b   : > { %v4159_v45 = vadd.f32 %v1156_v9, %v888_v1  ;;  %v4161_v51 = vadd.f32 %v1160_v23, %v889_v33  ;;  %v1393_v8 = vmul.f32 %v4119_v49, %v4066_v11  ;;  %v1394_v10 = vmul.f32 %v4106_v55, %v4066_v11 }
 0x17c   : > { %v4167_v54 = vadd.f32 %v1164_v39, %v888_v1  ;;  %v4169_v59 = vadd.f32 %v1168_v26, %v889_v33  ;;  %v4179_v13 = vadd.f32 %v1180_v30, %v888_v1  ;;  %v4181_v15 = vadd.f32 %v1184_v36, %v889_v33 }
 0x17d   : > { %v4108_v35 = vpop.permute.xlu1 %1449  ;;  %v4136_v19 = vpop.permute.xlu0 %1555  ;;  %v4189_v48 = vadd.f32 %v1196_v43, %v888_v1  ;;  %v4191_v22 = vadd.f32 %v1200_v44, %v889_v33  ;;  %v1497_v5 = vmul.f32 %v4122_v58, %v4064_v7  ;;  %v1498_v11 = vmul.f32 %v4116_v4, %v4064_v7 }
 0x17e   : > { %4636 = vst [vmem:[#allocation31_spill] sm:$0xff] %v4179_v13  ;;  %4637 = vst [vmem:[#allocation32_spill] sm:$0xff] %v4181_v15  ;;  %v1710_v9 = vmul.f32 %v3845_v6, %v4070_v12  ;;  %v1604_v1 = vmul.f32 %v3811_v56, %v4068_v41  ;;  %v1605_v33 = vmul.f32 %v4129_v63, %v4074_v16 }
 0x17f   : > { %4638 = vst [vmem:[#allocation33_spill] sm:$0xff] %v4189_v48  ;;  %4639 = vst [vmem:[#allocation34_spill] sm:$0xff] %v4191_v22  ;;  %v1606_v23 = vmul.f32 %v3811_v56, %v4074_v16  ;;  %v4211_v7 = vmul.f32 %v4122_v58, %v4078_v46  ;;  %v4215_v12 = vmul.f32 %v4116_v4, %v4078_v46 }
 0x180   : > { %v1499_v41 = vmul.f32 %v4122_v58, %v4072_v14  ;;  %v1500_v26 = vmul.f32 %v4116_v4, %v4072_v14  ;;  %v4225_v16 = vmul.f32 %v4119_v49, %v4083_v29  ;;  %v4229_v37 = vmul.f32 %v4106_v55, %v4083_v29 }
 0x181   : > { %v4149_v61 = vpop.permute.xlu1 %1349  ;;  %v1457_v28 = vpop.permute.xlu0 %1456  ;;  %v1395_v44 = vmul.f32 %v4119_v49, %v4076_v27  ;;  %v1396_v14 = vmul.f32 %v4106_v55, %v4076_v27  ;;  %v4243_v29 = vmul.f32 %v3845_v6, %v4100_v53  ;;  %v1711_v22 = vmul.f32 %v4125_v3, %v4080_v62 }
 0x182   : > { %v1712_v27 = vmul.f32 %v3845_v6, %v4080_v62  ;;  %v4253_v48 = vmul.f32 %v4129_v63, %v4136_v19  ;;  %v1505_v62 = vmul.f32 %v4122_v58, %v1457_v28 }
 0x184   : > { %4640 = vst [vmem:[#allocation35_spill] sm:$0xff] %v4253_v48 }
 0x185   : > { %v4187_v47 = vpop.permute.xlu1 %1661 }
 0x1be   : > { %v1236_v24 = vpop.permute.xlu0 %1235 }
 0x1bf   : > { %v1284_v57 = vmul.f32 %v4132_v17, %v1236_v24  ;;  %v1285_v39 = vmul.f32 %v4139_v20, %v1236_v24  ;;  %v4239_v24 = vmul.f32 %v4125_v3, %v4100_v53  ;;  %v4257_v53 = vmul.f32 %v3811_v56, %v4136_v19 }
 0x1c0   : > { %v1241_v46 = vpop.permute.xlu1 %1240 }
 0x1c1   : > { %v1300_v38 = vadd.f32 %v1284_v57, %v1217_v2  ;;  %v1301_v30 = vadd.f32 %v1285_v39, %v1218_v18  ;;  %v1286_v36 = vmul.f32 %v4132_v17, %v1241_v46  ;;  %v1287_v43 = vmul.f32 %v4139_v20, %v1241_v46  ;;  %4641 = vst [vmem:[#allocation36_spill] sm:$0xff] %v4257_v53 }
 0x1c2   : > { %v4245_v2 = vpop.permute.xlu0 %1356 }
 0x1c3   : > { %v1407_v18 = vadd.f32 %v1391_v21, %v1300_v38  ;;  %v1408_v57 = vadd.f32 %v1392_v25, %v1301_v30  ;;  %v1302_v39 = vadd.f32 %v1286_v36, %v1219_v34  ;;  %v1303_v46 = vadd.f32 %v1287_v43, %v1220_v42 }
 0x1c4   : > { %v1563_v15 = vpop.permute.xlu1 %1562  ;;  %v4261_v21 = vmul.f32 %v4129_v63, %v4087_v32  ;;  %v1608_v38 = vmul.f32 %v3811_v56, %v4087_v32  ;;  %v1506_v30 = vmul.f32 %v4116_v4, %v1457_v28  ;;  %v1399_v28 = vmul.f32 %v4119_v49, %v4149_v61 }
 0x1c5   : > { %v1513_v34 = vadd.f32 %v1497_v5, %v1407_v18  ;;  %v1409_v42 = vadd.f32 %v1393_v8, %v1302_v39  ;;  %v1410_v25 = vadd.f32 %v1394_v10, %v1303_v46  ;;  %v1514_v43 = vadd.f32 %v1498_v11, %v1408_v57 }
 0x1c6   : > { %v1246_v36 = vpop.permute.xlu0 %1245  ;;  %v4271_v5 = vmul.f32 %v4122_v58, %v4108_v35  ;;  %v1504_v8 = vmul.f32 %v4116_v4, %v4108_v35  ;;  %v1400_v11 = vmul.f32 %v4106_v55, %v4149_v61 }
 0x1c7   : > { %v1515_v48 = vadd.f32 %v1499_v41, %v1409_v42  ;;  %v1516_v19 = vadd.f32 %v1500_v26, %v1410_v25  ;;  %v1288_v53 = vmul.f32 %v4132_v17, %v1246_v36  ;;  %v1289_v13 = vmul.f32 %v4139_v20, %v1246_v36 }
 0x1c8   : > { %v4275_v32 = vpop.permute.xlu1 %1463  ;;  %v1620_v10 = vadd.f32 %v1604_v1, %v1514_v43  ;;  %v1619_v18 = vadd.f32 %v1603_v31, %v1513_v34  ;;  %v4289_v1 = vmul.f32 %v4125_v3, %v4187_v47  ;;  %v4293_v31 = vmul.f32 %v3845_v6, %v4187_v47 }
 0x1c9   : > { %v1304_v41 = vadd.f32 %v1288_v53, %v4159_v45  ;;  %v1305_v26 = vadd.f32 %v1289_v13, %v4161_v51  ;;  %v1622_v46 = vadd.f32 %v1606_v23, %v1516_v19  ;;  %v1621_v35 = vadd.f32 %v1605_v33, %v1515_v48 }
 0x1ca   : > { %v4283_v57 = vadd.f32 %v1710_v9, %v1620_v10  ;;  %v4285_v39 = vadd.f32 %v1709_v50, %v1619_v18  ;;  %v1401_v10 = vmul.f32 %v4119_v49, %v4245_v2  ;;  %v1611_v18 = vmul.f32 %v4129_v63, %v1563_v15 }
 0x1cb   : > { %v1411_v34 = vadd.f32 %v1395_v44, %v1304_v41  ;;  %v1412_v61 = vadd.f32 %v1396_v14, %v1305_v26  ;;  %v4297_v50 = vadd.f32 %v1712_v27, %v1622_v46  ;;  %v4299_v9 = vadd.f32 %v1711_v22, %v1621_v35 }
 0x1cc   : > { %v1256_v42 = vpop.permute.xlu1 %1255  ;;  %v1251_v45 = vpop.permute.xlu0 %1250  ;;  %v1742_v51 = vmul.f32 0.5, %v4283_v57  ;;  %v1741_v13 = vmul.f32 0.5, %v4285_v39 }
 0x1cd   : > { %v1517_v48 = vadd.f32 %v4211_v7, %v1411_v34  ;;  %v1518_v33 = vadd.f32 %v4215_v12, %v1412_v61  ;;  %v1292_v23 = vmul.f32 %v4132_v17, %v1256_v42  ;;  %v1293_v47 = vmul.f32 %v4139_v20, %v1256_v42 }
 0x1ce   : > { %v1290_v44 = vmul.f32 %v4132_v17, %v1251_v45  ;;  %v1291_v14 = vmul.f32 %v4139_v20, %v1251_v45  ;;  %2999 = vtanh.f32 %v1742_v51  ;;  %v1744_v53 = vmul.f32 0.5, %v4297_v50 }
 0x1cf   : > { %v1308_v27 = vadd.f32 %v1292_v23, %v4163_v52  ;;  %v1309_v22 = vadd.f32 %v1293_v47, %v4165_v40  ;;  %3001 = vtanh.f32 %v1741_v13  ;;  %v1743_v7 = vmul.f32 0.5, %v4299_v9  ;;  %v4642_v47 = vld [vmem:[#allocation31_spill] sm:$0xff] }
 0x1d0   : > { %v1306_v12 = vadd.f32 %v1290_v44, %v4167_v54  ;;  %v1307_v25 = vadd.f32 %v1291_v14, %v4169_v59  ;;  %v1364_v36 = vpop.permute.xlu1 %1363  ;;  %v1669_v43 = vpop.permute.xlu0 %1668  ;;  %3003 = vtanh.f32 %v1744_v53  ;;  %v1624_v19 = vadd.f32 %v1608_v38, %v1518_v33  ;;  %v4643_v14 = vld [vmem:[#allocation32_spill] sm:$0xff] }
 0x1d1   : > { %v1415_v41 = vadd.f32 %v1399_v28, %v1308_v27  ;;  %v1416_v52 = vadd.f32 %v1400_v11, %v1309_v22  ;;  %v1612_v40 = vmul.f32 %v3811_v56, %v1563_v15  ;;  %v1404_v54 = vmul.f32 %v4106_v55, %v1364_v36 }
 0x1d2   : > { %v1413_v26 = vadd.f32 %v4225_v16, %v1306_v12  ;;  %v1414_v46 = vadd.f32 %v4229_v37, %v1307_v25  ;;  %3005 = vtanh.f32 %v1743_v7  ;;  %v4321_v38 = vadd.f32 %v4243_v29, %v1624_v19 }
 0x1d3   : > { %v1521_v59 = vadd.f32 %v1505_v62, %v1415_v41  ;;  %v1522_v35 = vadd.f32 %v1506_v30, %v1416_v52  ;;  %v1717_v61 = vmul.f32 %v4125_v3, %v1669_v43  ;;  %v1718_v28 = vmul.f32 %v3845_v6, %v1669_v43 }
 0x1d4   : > { %v1520_v34 = vadd.f32 %v1504_v8, %v1414_v46  ;;  %v1266_v11 = vpop.permute.xlu1 %1265  ;;  %v1261_v42 = vpop.permute.xlu0 %1260  ;;  %v1623_v15 = vadd.f32 %v4261_v21, %v1517_v48  ;;  %v1746_v8 = vmul.f32 0.5, %v4321_v38  ;;  %v1402_v23 = vmul.f32 %v4106_v55, %v4245_v2 }
 0x1d5   : > { %v1627_v16 = vadd.f32 %v1611_v18, %v1521_v59  ;;  %v1628_v45 = vadd.f32 %v1612_v40, %v1522_v35  ;;  %v1296_v37 = vmul.f32 %v4132_v17, %v1266_v11  ;;  %v1297_v62 = vmul.f32 %v4139_v20, %v1266_v11  ;;  %v4644_v40 = vld [vmem:[#allocation36_spill] sm:$0xff] }
 0x1d6   : > { %v1294_v30 = vmul.f32 %v4132_v17, %v1261_v42  ;;  %v1295_v29 = vmul.f32 %v4139_v20, %v1261_v42  ;;  %v4332_v51 = vadd.f32 %v4239_v24, %v1623_v15  ;;  %3007 = vtanh.f32 %v1746_v8 }
 0x1d7   : > { %v4334_v13 = vadd.f32 %v1717_v61, %v1627_v16  ;;  %v4336_v33 = vadd.f32 %v1718_v28, %v1628_v45  ;;  %v1312_v21 = vadd.f32 %v1296_v37, %v4171_v60  ;;  %v1313_v48 = vadd.f32 %v1297_v62, %v4173_v0  ;;  %v4645_v62 = vld [vmem:[#allocation33_spill] sm:$0xff] }
 0x1d8   : > { %v1310_v44 = vadd.f32 %v1294_v30, %v4642_v47  ;;  %v1311_v53 = vadd.f32 %v1295_v29, %v4643_v14  ;;  %v1471_v27 = vpop.permute.xlu1 %1470  ;;  %v1570_v22 = vpop.permute.xlu0 %1569  ;;  %v1507_v24 = vmul.f32 %v4122_v58, %v4275_v32  ;;  %v1508_v7 = vmul.f32 %v4116_v4, %v4275_v32 }
 0x1d9   : > { %v1403_v60 = vmul.f32 %v4119_v49, %v1364_v36  ;;  %v1420_v12 = vadd.f32 %v1404_v54, %v1313_v48  ;;  %v4350_v0 = vadd.f32 %v4271_v5, %v1413_v26  ;;  %v1510_v43 = vmul.f32 %v4116_v4, %v1471_v27 }
 0x1da   : > { %v1417_v2 = vadd.f32 %v1401_v10, %v1310_v44  ;;  %v1418_v25 = vadd.f32 %v1402_v23, %v1311_v53  ;;  %v1750_v18 = vmul.f32 0.5, %v4336_v33  ;;  %v1745_v52 = vmul.f32 0.5, %v4332_v51 }
 0x1db   : > { %v3000_v19 = vpop.eup %2999  ;;  %v1419_v41 = vadd.f32 %v1403_v60, %v1312_v21  ;;  %v1626_v46 = vadd.f32 %v4644_v40, %v1520_v34  ;;  %v1509_v32 = vmul.f32 %v4122_v58, %v1471_v27  ;;  %v1526_v36 = vadd.f32 %v1510_v43, %v1420_v12  ;;  %v4646_v21 = vld [vmem:[#allocation34_spill] sm:$0xff] }
 0x1dc   : > { %v3002_v59 = vpop.eup %3001  ;;  %v1613_v54 = vmul.f32 %v4129_v63, %v1570_v22  ;;  %v1614_v5 = vmul.f32 %v3811_v56, %v1570_v22  ;;  %v1371_v10 = vpop.permute.xlu1 %1370  ;;  %v1523_v61 = vadd.f32 %v1507_v24, %v1417_v2  ;;  %v1524_v28 = vadd.f32 %v1508_v7, %v1418_v25 }
 0x1dd   : > { %v1271_v26 = vpop.permute.xlu0 %1270  ;;  %v3004_v35 = vpop.eup %3003  ;;  %v1405_v11 = vmul.f32 %v4119_v49, %v1371_v10  ;;  %v1406_v15 = vmul.f32 %v4106_v55, %v1371_v10  ;;  %v1774_v16 = vmul.f32 0.5, %v3000_v19  ;;  %v1773_v45 = vmul.f32 0.5, %v3002_v59 }
 0x1de   : > { %v1298_v42 = vmul.f32 %v4132_v17, %v1271_v26  ;;  %v1299_v34 = vmul.f32 %v4139_v20, %v1271_v26  ;;  %v1630_v37 = vadd.f32 %v1614_v5, %v1524_v28  ;;  %v1776_v29 = vmul.f32 0.5, %v3004_v35 }
 0x1df   : > { %3009 = vtanh.f32 %v1745_v52  ;;  %v3006_v8 = vpop.eup %3005  ;;  %v1790_v44 = vadd.f32 0.5, %v1774_v16  ;;  %v1789_v49 = vadd.f32 0.5, %v1773_v45  ;;  %v4366_v17 = vadd.f32 %v4293_v31, %v1626_v46 }
 0x1e0   : > { %v1314_v30 = vadd.f32 %v1298_v42, %v4645_v62  ;;  %v1315_v48 = vadd.f32 %v1299_v34, %v4646_v21  ;;  %v1478_v23 = vpop.permute.xlu1 %1477  ;;  %v1749_v55 = vmul.f32 0.5, %v4334_v13  ;;  %v1629_v20 = vadd.f32 %v1613_v54, %v1523_v61  ;;  %v4647_v54 = vld [vmem:[#allocation35_spill] sm:$0xff] }
 0x1e1   : > { %v1676_v47 = vpop.permute.xlu0 %1675  ;;  %v1512_v14 = vmul.f32 %v4116_v4, %v1478_v23  ;;  %v1806_v24 = vmul.f32 %v1790_v44, %v4283_v57  ;;  %v1805_v7 = vmul.f32 %v1789_v49, %v4285_v39  ;;  %3011 = vtanh.f32 %v1750_v18 }
 0x1e2   : > { %v1719_v53 = vmul.f32 %v4125_v3, %v1676_v47  ;;  %v1422_v27 = vadd.f32 %v1406_v15, %v1315_v48  ;;  %v1720_v22 = vmul.f32 %v3845_v6, %v1676_v47  ;;  %v1792_v12 = vadd.f32 0.5, %v1776_v29 }
 0x1e3   : > { %v1775_v31 = vmul.f32 0.5, %v3006_v8  ;;  %v1525_v2 = vadd.f32 %v1509_v32, %v1419_v41  ;;  %v1421_v25 = vadd.f32 %v1405_v11, %v1314_v30  ;;  %1924 = vmatprep.mubr.f32.mxu0 %v1806_v24  ;;  %v3008_v40 = vpop.eup %3007  ;;  %v1511_v46 = vmul.f32 %v4122_v58, %v1478_v23 }
 0x1e4   : > { %v4374_v60 = vadd.f32 %v1719_v53, %v1629_v20  ;;  %v1528_v43 = vadd.f32 %v1512_v14, %v1422_v27  ;;  %v4376_v19 = vadd.f32 %v1720_v22, %v1630_v37  ;;  %v1584_v4 = vpop.permute.xlu1 %1583  ;;  %1925 = vmatmul.mubr.f32.vlgmr.msra.gmra.mxu0 %v1805_v7  ;;  %v1808_v57 = vmul.f32 %v1792_v12, %v4297_v50 }
 0x1e5   : > { %v1577_v52 = vpop.permute.xlu0 %1576  ;;  %v1618_v39 = vmul.f32 %v3811_v56, %v1584_v4  ;;  %v1748_v18 = vmul.f32 0.5, %v4366_v17  ;;  %v1791_v32 = vadd.f32 0.5, %v1775_v31  ;;  %v1625_v5 = vadd.f32 %v4647_v54, %v4350_v0 }
 0x1e6   : > { %v1615_v59 = vmul.f32 %v4129_v63, %v1577_v52  ;;  %v1616_v41 = vmul.f32 %v3811_v56, %v1577_v52  ;;  %v1751_v10 = vmul.f32 0.5, %v4374_v60  ;;  %v1752_v26 = vmul.f32 0.5, %v4376_v19  ;;  %1929 = vmatprep.mubr.f32.mxu0 %v1808_v57 }
 0x1e7   : > { %v1634_v58 = vadd.f32 %v1618_v39, %v1528_v43  ;;  %v1778_v35 = vmul.f32 0.5, %v3008_v40  ;;  %v1617_v50 = vmul.f32 %v4129_v63, %v1584_v4  ;;  %v1807_v11 = vmul.f32 %v1791_v32, %v4299_v9 }
 0x1e8   : > { %v1631_v61 = vadd.f32 %v1615_v59, %v1525_v2  ;;  %v1632_v28 = vadd.f32 %v1616_v41, %v1526_v36  ;;  %3013 = vtanh.f32 %v1748_v18  ;;  %v1527_v0 = vadd.f32 %v1511_v46, %v1421_v25 }
 0x1e9   : > { %v1683_v42 = vpop.permute.xlu0 %1682  ;;  %v1794_v34 = vadd.f32 0.5, %v1778_v35  ;;  %3015 = vtanh.f32 %v1749_v55  ;;  %1930 = vmatmul.mubr.f32.gmra.mxu0 %v1807_v11  ;;  %v1731_v16 = vadd.f32 %v4289_v1, %v1625_v5 }
 0x1ea   : > { %v1721_v56 = vmul.f32 %v4125_v3, %v1683_v42  ;;  %v1722_v15 = vmul.f32 %v3845_v6, %v1683_v42  ;;  %3017 = vtanh.f32 %v1752_v26  ;;  %v1633_v30 = vadd.f32 %v1617_v50, %v1527_v0  ;;  %v2120_v0 = vld [vmem:[#allocation15 + $0x60] sm:$0xff] }
 0x1eb   : > { %v1810_v36 = vmul.f32 %v1794_v34, %v4321_v38  ;;  %3019 = vtanh.f32 %v1751_v10  ;;  %v1747_v62 = vmul.f32 0.5, %v1731_v16  ;;  %v2121_v34 = vld [vmem:[#allocation15 + $0x68] sm:$0xff] }
 0x1ec   : > { %v4393_v45 = vadd.f32 %v1721_v56, %v1631_v61  ;;  %v4395_v63 = vadd.f32 %v1722_v15, %v1632_v28  ;;  %v3010_v9 = vpop.eup %3009  ;;  %v2122_v15 = vld [vmem:[#allocation15 + $0x70] sm:$0xff] }
 0x1ed   : > { %v1690_v37 = vpop.permute.xlu0 %1689  ;;  %1934 = vmatprep.mubr.f32.mxu0 %v1810_v36  ;;  %v1777_v8 = vmul.f32 0.5, %v3010_v9  ;;  %3021 = vtanh.f32 %v1747_v62  ;;  %v2116_v36 = vld [vmem:[#allocation15 + $0x40] sm:$0xff]  ;;  %v2115_v9 = vld [vmem:[#allocation15 + $0x38] sm:$0xff]  ;;  %v2113_v62 = vld [vmem:[#allocation15 + $0x28] sm:$0xff] }
 0x1ee   : > { %v1754_v29 = vmul.f32 0.5, %v4395_v63  ;;  %v1723_v21 = vmul.f32 %v4125_v3, %v1690_v37  ;;  %v1753_v1 = vmul.f32 0.5, %v4393_v45  ;;  %v1724_v48 = vmul.f32 %v3845_v6, %v1690_v37  ;;  %v3012_v44 = vpop.eup %3011  ;;  %v2114_v37 = vld [vmem:[#allocation15 + $0x30] sm:$0xff] }
 0x1ef   : > { %v1793_v23 = vadd.f32 0.5, %v1777_v8  ;;  %v1782_v24 = vmul.f32 0.5, %v3012_v44  ;;  %v2110_v8 = vld [vmem:[#allocation15 + $0x10] sm:$0xff] }
 0x1f0   : > { %v1739_v47 = vadd.f32 %v1723_v21, %v1633_v30  ;;  %3023 = vtanh.f32 %v1754_v29  ;;  %v1740_v38 = vadd.f32 %v1724_v48, %v1634_v58  ;;  %v2112_v30 = vld [vmem:[#allocation15 + $0x20] sm:$0xff]  ;;  %v2111_v29 = vld [vmem:[#allocation15 + $0x18] sm:$0xff]  ;;  %v2109_v21 = vld [vmem:[#allocation15 + $0x8] sm:$0xff] }
 0x1f1   : > { %v1809_v49 = vmul.f32 %v1793_v23, %v4332_v51  ;;  %3025 = vtanh.f32 %v1753_v1  ;;  %v1798_v43 = vadd.f32 0.5, %v1782_v24  ;;  %v2108_v1 = vld [vmem:[#allocation15] sm:$0xff] }
 0x1f2   : > { %v1755_v55 = vmul.f32 0.5, %v1739_v47  ;;  %v1756_v20 = vmul.f32 0.5, %v1740_v38 }
 0x1f3   : > { %1935 = vmatmul.mubr.f32.gmra.mxu0 %v1809_v49  ;;  %v1814_v41 = vmul.f32 %v1798_v43, %v4336_v33 }
 0x1f4   : > { %3027 = vtanh.f32 %v1756_v20 }
 0x1f5   : > { %v3014_v14 = vpop.eup %3013  ;;  %3029 = vtanh.f32 %v1755_v55 }
 0x1f6   : > { %v3016_v3 = vpop.eup %3015  ;;  %v1780_v53 = vmul.f32 0.5, %v3014_v14 }
 0x1f7   : > { %v3018_v27 = vpop.eup %3017  ;;  %v1781_v25 = vmul.f32 0.5, %v3016_v3  ;;  %v2680_v3 = vld [vmem:[#allocation12] ss:$0 sm:$0xff] }
 0x1f8   : > { %v3020_v22 = vpop.eup %3019  ;;  %v1796_v6 = vadd.f32 0.5, %v1780_v53  ;;  %v1784_v31 = vmul.f32 0.5, %v3018_v27 }
 0x1f9   : > { %v1783_v52 = vmul.f32 0.5, %v3020_v22  ;;  %v1797_v18 = vadd.f32 0.5, %v1781_v25 }
 0x1fa   : > { %v3022_v7 = vpop.eup %3021  ;;  %v1812_v12 = vmul.f32 %v1796_v6, %v4366_v17  ;;  %v1800_v46 = vadd.f32 0.5, %v1784_v31 }
 0x1fb   : > { %v1779_v2 = vmul.f32 0.5, %v3022_v7  ;;  %v1799_v32 = vadd.f32 0.5, %v1783_v52  ;;  %v1813_v58 = vmul.f32 %v1797_v18, %v4334_v13  ;;  %v3381_v13 = vmov 0.0  }
 0x1fc   : > { %1939 = vmatprep.mubr.f32.mxu0 %v1812_v12  ;;  %v1816_v5 = vmul.f32 %v1800_v46, %v4376_v19  ;;  %2786 = vmatprep.subr.mxu1 %v3381_v13 }
 0x1fd   : > { %v3024_v51 = vpop.eup %3023  ;;  %v1795_v4 = vadd.f32 0.5, %v1779_v2  ;;  %v1815_v35 = vmul.f32 %v1799_v32, %v4374_v60  ;;  %v2123_v60 = vld [vmem:[#allocation15 + $0x78] sm:$0xff]  ;;  %2832 = vmatprep.subr.mxu0 %v3381_v13  ;;  %2818 = vmatprep.mubr.msk.f32.mxu1 %vm3382_vm0, %v3381_v13 }
 0x1fe   : > { %v3026_v40 = vpop.eup %3025  ;;  %v1786_v57 = vmul.f32 0.5, %v3024_v51  ;;  %2787 = vmatpush3.msra.mxu1 %v2123_v60 }
 0x1ff   : > { %v1811_v39 = vmul.f32 %v1795_v4, %v1731_v16  ;;  %v1785_v54 = vmul.f32 0.5, %v3026_v40  ;;  %2788 = vmatprep.subr.mxu1 %v3381_v13  ;;  %v2119_v16 = vld [vmem:[#allocation15 + $0x58] sm:$0xff] }
 0x200   : > { %v1802_v10 = vadd.f32 0.5, %v1786_v57  ;;  %2789 = vmatpush3.msra.mxu1 %v2122_v15 }
 0x201   : > { %v3028_v59 = vpop.eup %3027  ;;  %1940 = vmatmul.mubr.f32.gmra.mxu0 %v1811_v39  ;;  %v1801_v50 = vadd.f32 0.5, %v1785_v54  ;;  %2790 = vmatprep.subr.mxu1 %v3381_v13 }
 0x202   : > { %v3030_v17 = vpop.eup %3029  ;;  %1944 = vmatprep.mubr.f32.mxu0 %v1814_v41  ;;  %v1788_v26 = vmul.f32 0.5, %v3028_v59  ;;  %v1818_v28 = vmul.f32 %v1802_v10, %v4395_v63  ;;  %2791 = vmatpush3.msra.mxu1 %v2121_v34  ;;  %v2117_v63 = vld [vmem:[#allocation15 + $0x48] sm:$0xff] }
 0x203   : > { %v1787_v61 = vmul.f32 0.5, %v3030_v17  ;;  %v1817_v11 = vmul.f32 %v1801_v50, %v4393_v45  ;;  %2792 = vmatprep.subr.mxu1 %v3381_v13  ;;  %v2118_v45 = vld [vmem:[#allocation15 + $0x50] sm:$0xff] }
 0x204   : > { %v1804_v33 = vadd.f32 0.5, %v1788_v26  ;;  %2793 = vmatpush3.msra.mxu1 %v2120_v0 }
 0x205   : > { %1945 = vmatmul.mubr.f32.gmra.mxu0 %v1813_v58  ;;  %v1803_v42 = vadd.f32 0.5, %v1787_v61  ;;  %2794 = vmatprep.subr.mxu1 %v3381_v13 }
 0x206   : > { %1949 = vmatprep.mubr.f32.mxu0 %v1816_v5  ;;  %v1820_v56 = vmul.f32 %v1804_v33, %v1740_v38  ;;  %2795 = vmatpush3.msra.mxu1 %v2119_v16 }
 0x207   : > { %v1819_v19 = vmul.f32 %v1803_v42, %v1739_v47  ;;  %2796 = vmatprep.subr.mxu1 %v3381_v13 }
 0x208   : > { %2797 = vmatpush3.msra.mxu1 %v2118_v45 }
 0x209   : > { %1950 = vmatmul.mubr.f32.gmra.mxu0 %v1815_v35  ;;  %2798 = vmatprep.subr.mxu1 %v3381_v13 }
 0x20a   : > { %1954 = vmatprep.mubr.f32.mxu0 %v1818_v28  ;;  %2799 = vmatpush3.msra.mxu1 %v2117_v63 }
 0x20b   : > { %2800 = vmatprep.subr.mxu1 %v3381_v13 }
 0x20c   : > { %2801 = vmatpush3.msra.mxu1 %v2116_v36 }
 0x20d   : > { %1955 = vmatmul.mubr.f32.gmra.mxu0 %v1817_v11  ;;  %2802 = vmatprep.subr.mxu1 %v3381_v13 }
 0x20e   : > { %1959 = vmatprep.mubr.f32.mxu0 %v1820_v56  ;;  %2803 = vmatpush3.msra.mxu1 %v2115_v9  ;;  %v2009_v9 = vpop.permute.xlu1 %2008 }
 0x20f   : > { %2804 = vmatprep.subr.mxu1 %v3381_v13 }
 0x210   : > { %2805 = vmatpush3.msra.mxu1 %v2114_v37 }
 0x211   : > { %1960 = vmatmul.mubr.f32.gmra.mxu0 %v1819_v19  ;;  %2806 = vmatprep.subr.mxu1 %v3381_v13 }
 0x212   : > { %2864 = vmatprep.mubr.msk.f32.mxu0 %vm3382_vm0, %v3381_v13  ;;  %2807 = vmatpush3.msra.mxu1 %v2113_v62 }
 0x213   : > { %2808 = vmatprep.subr.mxu1 %v3381_v13 }
 0x214   : > { %2809 = vmatpush3.msra.mxu1 %v2112_v30 }
 0x215   : > { %2810 = vmatprep.subr.mxu1 %v3381_v13 }
 0x216   : > { %2811 = vmatpush3.msra.mxu1 %v2111_v29 }
 0x217   : > { %2812 = vmatprep.subr.mxu1 %v3381_v13 }
 0x218   : > { %2813 = vmatpush3.msra.mxu1 %v2110_v8 }
 0x219   : > { %2814 = vmatprep.subr.mxu1 %v3381_v13 }
 0x21a   : > { %2815 = vmatpush3.msra.mxu1 %v2109_v21 }
 0x21b   : > { %2816 = vmatprep.subr.mxu1 %v3381_v13 }
 0x21c   : > { %2817 = vmatpush3.msra.mxu1 %v2108_v1 }
 0x21d   : > { %2821 = vmatprep.subr.mxu1 %v3381_v13 }
 0x2a4   : > { %v2723_v48 = vpop.f32.mrf.mxu0 }
 0x2a6   : > { %v2724_v23 = vpop.f32.mrf.mxu0 }
 0x2a7   : > { %v2725_v20 = vadd.f32 %v2724_v23, %v2723_v48 }
 0x2a9   : > { %v2726_v47 = vpop.f32.mrf.mxu0  ;;  %v1927_v22 = vadd.f32 %v2725_v20, %v2680_v3 }
 0x2ab   : > { %v2727_v44 = vpop.f32.mrf.mxu0  ;;  %v1965_v7 = vmul.f32 0.5, %v1927_v22 }
 0x2ac   : > { %v2728_v49 = vadd.f32 %v2727_v44, %v2726_v47 }
 0x2ae   : > { %v1932_v53 = vadd.f32 %v2728_v49, %v2680_v3 }
 0x2b0   : > { %v1966_v6 = vmul.f32 0.5, %v1932_v53 }
 0x2b2   : > { %3031 = vtanh.f32 %v1966_v6 }
 0x2b3   : > { %v2729_v38 = vpop.f32.mrf.mxu0 }
 0x2b5   : > { %v2730_v55 = vpop.f32.mrf.mxu0 }
 0x2b6   : > { %v2731_v14 = vadd.f32 %v2730_v55, %v2729_v38 }
 0x2b8   : > { %v1937_v27 = vadd.f32 %v2731_v14, %v2680_v3 }
 0x2ba   : > { %v1967_v24 = vmul.f32 0.5, %v1937_v27 }
 0x2bc   : > { %3033 = vtanh.f32 %v1967_v24 }
 0x2bd   : > { %3035 = vtanh.f32 %v1965_v7 }
 0x2bf   : > { %v3032_v39 = vpop.eup %3031 }
 0x2c0   : > { %v1982_v5 = vmul.f32 0.5, %v3032_v39 }
 0x2c1   : > { %v2732_v12 = vpop.f32.mrf.mxu0 }
 0x2c2   : > { %v1990_v33 = vadd.f32 0.5, %v1982_v5 }
 0x2c3   : > { %v2733_v31 = vpop.f32.mrf.mxu0 }
 0x2c4   : > { %v2734_v2 = vadd.f32 %v2733_v31, %v2732_v12  ;;  %v1998_v0 = vmul.f32 %v1990_v33, %v1932_v53 }
 0x2c5   : > { %v2735_v25 = vpop.f32.mrf.mxu0 }
 0x2c6   : > { %v1942_v51 = vadd.f32 %v2734_v2, %v2680_v3  ;;  %v2012_v30 = vmul.f32 %v2009_v9, %v1998_v0 }
 0x2c7   : > { %v2736_v43 = vpop.f32.mrf.mxu0 }
 0x2c8   : > { %v1968_v4 = vmul.f32 0.5, %v1942_v51  ;;  %v2737_v52 = vadd.f32 %v2736_v43, %v2735_v25  ;;  %v2025_v44 = vrot.slane %v2012_v30, 4 }
 0x2c9   : > { %v2738_v40 = vpop.f32.mrf.mxu0  ;;  %v3034_v41 = vpop.eup %3033 }
 0x2ca   : > { %3037 = vtanh.f32 %v1968_v4  ;;  %v1947_v46 = vadd.f32 %v2737_v52, %v2680_v3  ;;  %v3036_v54 = vpop.eup %3035  ;;  %v1983_v26 = vmul.f32 0.5, %v3034_v41 }
 0x2cb   : > { %v2739_v57 = vpop.f32.mrf.mxu0  ;;  %v1981_v50 = vmul.f32 0.5, %v3036_v54 }
 0x2cc   : > { %v1969_v18 = vmul.f32 0.5, %v1947_v46  ;;  %v2740_v59 = vadd.f32 %v2739_v57, %v2738_v40  ;;  %v1991_v42 = vadd.f32 0.5, %v1983_v26 }
 0x2cd   : > { %v2741_v32 = vpop.f32.mrf.mxu0  ;;  %v1989_v60 = vadd.f32 0.5, %v1981_v50 }
 0x2ce   : > { %3039 = vtanh.f32 %v1969_v18  ;;  %v1952_v17 = vadd.f32 %v2740_v59, %v2680_v3  ;;  %v1999_v16 = vmul.f32 %v1991_v42, %v1937_v27 }
 0x2cf   : > { %v2742_v10 = vpop.f32.mrf.mxu0  ;;  %v1997_v36 = vmul.f32 %v1989_v60, %v1927_v22  ;;  %v2026_v22 = vadd.f32 %v2025_v44, %v2012_v30 }
 0x2d0   : > { %v1970_v58 = vmul.f32 0.5, %v1952_v17  ;;  %v2743_v35 = vadd.f32 %v2742_v10, %v2741_v32  ;;  %v2013_v29 = vmul.f32 %v2009_v9, %v1999_v16 }
 0x2d1   : > { %v2744_v61 = vpop.f32.mrf.mxu0  ;;  %v2011_v1 = vmul.f32 %v2009_v9, %v1997_v36  ;;  %v2027_v52 = vrot.slane %v2026_v22, 2 }
 0x2d2   : > { %3041 = vtanh.f32 %v1970_v58  ;;  %v1957_v28 = vadd.f32 %v2743_v35, %v2680_v3  ;;  %v2031_v38 = vrot.slane %v2013_v29, 4 }
 0x2d3   : > { %v2745_v11 = vpop.f32.mrf.mxu0  ;;  %v2019_v20 = vrot.slane %v2011_v1, 4  ;;  %v2028_v5 = vadd.f32 %v2027_v52, %v2026_v22  ;;  %v2291_v52 = vld [vmem:[%s4648_s20 + $0x50] sm:$0xff] }
 0x2d4   : > { %v1971_v56 = vmul.f32 0.5, %v1957_v28  ;;  %v2746_v19 = vadd.f32 %v2745_v11, %v2744_v61  ;;  %v2032_v6 = vadd.f32 %v2031_v38, %v2013_v29 }
 0x2d5   : > { %v2020_v31 = vadd.f32 %v2019_v20, %v2011_v1  ;;  %v2029_v42 = vrot.slane %v2028_v5, 1 }
 0x2d6   : > { %3043 = vtanh.f32 %v1971_v56  ;;  %v1962_v15 = vadd.f32 %v2746_v19, %v2680_v3  ;;  %v2033_v40 = vrot.slane %v2032_v6, 2 }
 0x2d7   : > { %v3038_v34 = vpop.eup %3037  ;;  %v2021_v39 = vrot.slane %v2020_v31, 2  ;;  %v2030_v36 = vadd.f32 %v2029_v42, %v2028_v5  ;;  %v2281_v5 = vld [vmem:[%s4648_s20] sm:$0xff] }
 0x2d8   : > { %v1984_v45 = vmul.f32 0.5, %v3038_v34  ;;  %v1972_v63 = vmul.f32 0.5, %v1962_v15 }
 0x2d9   : > { %v2022_v35 = vadd.f32 %v2021_v39, %v2020_v31  ;;  %v4437_v31 = vld [vmem:[%s3672_s26] sm:$0xff]  ;;  %v2287_v39 = vld [vmem:[%s4648_s20 + $0x30] sm:$0xff]  ;;  %s2377_s26 = scalar_lea.sflag [#allocation5], %s3666_s21 }
 0x2da   : > { %v1992_v37 = vadd.f32 0.5, %v1984_v45  ;;  %3045 = vtanh.f32 %v1972_v63 }
 0x2db   : > { %v3040_v62 = vpop.eup %3039  ;;  %v2023_v34 = vrot.slane %v2022_v35, 1 }
 0x2dc   : > { %v2000_v8 = vmul.f32 %v1992_v37, %v1942_v51  ;;  %v1985_v21 = vmul.f32 0.5, %v3040_v62 }
 0x2de   : > { %v2014_v48 = vmul.f32 %v2009_v9, %v2000_v8  ;;  %v1993_v23 = vadd.f32 0.5, %v1985_v21  ;;  %v2024_v8 = vadd.f32 %v2023_v34, %v2022_v35 }
 0x2df   : > { %v3042_v47 = vpop.eup %3041 }
 0x2e0   : > { %v2001_v49 = vmul.f32 %v1993_v23, %v1947_v46  ;;  %v1986_v55 = vmul.f32 0.5, %v3042_v47  ;;  %v2037_v14 = vrot.slane %v2014_v48, 4 }
 0x2e2   : > { %v2015_v3 = vmul.f32 %v2009_v9, %v2001_v49  ;;  %v1994_v53 = vadd.f32 0.5, %v1986_v55  ;;  %v2038_v2 = vadd.f32 %v2037_v14, %v2014_v48 }
 0x2e3   : > { %v3044_v27 = vpop.eup %3043 }
 0x2e4   : > { %v2043_v24 = vrot.slane %v2015_v3, 4  ;;  %v2002_v7 = vmul.f32 %v1994_v53, %v1952_v17  ;;  %v1987_v12 = vmul.f32 0.5, %v3044_v27  ;;  %v2039_v18 = vrot.slane %v2038_v2, 2  ;;  %v2101_v53 = vpop.permute.xlu0 %2100 }
 0x2e5   : > { %v2034_v17 = vadd.f32 %v2033_v40, %v2032_v6  ;;  %v2107_v6 = vld [vmem:[#allocation14 + $0x18] sm:$0xff]  ;;  %v2290_v40 = vld [vmem:[%s4648_s20 + $0x48] sm:$0xff] }
 0x2e6   : > { %v2044_v25 = vadd.f32 %v2043_v24, %v2015_v3  ;;  %v2016_v51 = vmul.f32 %v2009_v9, %v2002_v7  ;;  %v1995_v43 = vadd.f32 0.5, %v1987_v12  ;;  %v2040_v50 = vadd.f32 %v2039_v18, %v2038_v2  ;;  %v2106_v24 = vld [vmem:[#allocation14 + $0x10] sm:$0xff]  ;;  %v2105_v7 = vld [vmem:[#allocation14 + $0x8] sm:$0xff]  ;;  %v2104_v12 = vld [vmem:[#allocation14] sm:$0xff] }
 0x2e7   : > { %v3046_v4 = vpop.eup %3045  ;;  %v2296_v2 = vld [vmem:[%s4648_s20 + $0x78] sm:$0xff]  ;;  %v2286_v18 = vld [vmem:[%s4648_s20 + $0x28] sm:$0xff] }
 0x2e8   : > { %v2049_v46 = vrot.slane %v2016_v51, 4  ;;  %v2003_v57 = vmul.f32 %v1995_v43, %v1957_v28  ;;  %v1988_v59 = vmul.f32 0.5, %v3046_v4  ;;  %v2045_v41 = vrot.slane %v2044_v25, 2  ;;  %2833 = vmatpush3.msra.mxu0 %v2296_v2  ;;  %v2293_v43 = vld [vmem:[%s4648_s20 + $0x60] sm:$0xff]  ;;  %v2292_v4 = vld [vmem:[%s4648_s20 + $0x58] sm:$0xff] }
 0x2e9   : > { %v2035_v28 = vrot.slane %v2034_v17, 1  ;;  %v2041_v0 = vrot.slane %v2040_v50, 1  ;;  %2834 = vmatprep.subr.mxu0 %v3381_v13 }
 0x2ea   : > { %v2050_v32 = vadd.f32 %v2049_v46, %v2016_v51  ;;  %v2017_v54 = vmul.f32 %v2009_v9, %v2003_v57  ;;  %v1996_v10 = vadd.f32 0.5, %v1988_v59  ;;  %v2046_v33 = vadd.f32 %v2045_v41, %v2044_v25  ;;  %v2295_v25 = vld [vmem:[%s4648_s20 + $0x70] sm:$0xff]  ;;  %v2294_v51 = vld [vmem:[%s4648_s20 + $0x68] sm:$0xff]  ;;  %v2289_v46 = vld [vmem:[%s4648_s20 + $0x40] sm:$0xff] }
 0x2eb   : > { %v2036_v30 = vadd.f32 %v2035_v28, %v2034_v17  ;;  %2835 = vmatpush3.msra.mxu0 %v2295_v25  ;;  %v2288_v57 = vld [vmem:[%s4648_s20 + $0x38] sm:$0xff]  ;;  %v2285_v59 = vld [vmem:[%s4648_s20 + $0x20] sm:$0xff] }
 0x2ec   : > { %v2051_v26 = vrot.slane %v2050_v32, 2  ;;  %v2055_v58 = vrot.slane %v2017_v54, 4  ;;  %v2004_v61 = vmul.f32 %v1996_v10, %v1962_v15  ;;  %v2047_v45 = vrot.slane %v2046_v33, 1  ;;  %2836 = vmatprep.subr.mxu0 %v3381_v13  ;;  %v2284_v41 = vld [vmem:[%s4648_s20 + $0x18] sm:$0xff] }
 0x2ed   : > { %v2042_v15 = vadd.f32 %v2041_v0, %v2040_v50  ;;  %2837 = vmatpush3.msra.mxu0 %v2294_v51 }
 0x2ee   : > { %v2056_v11 = vadd.f32 %v2055_v58, %v2017_v54  ;;  %v2052_v56 = vadd.f32 %v2051_v26, %v2050_v32  ;;  %v2018_v19 = vmul.f32 %v2009_v9, %v2004_v61  ;;  %v2048_v1 = vadd.f32 %v2047_v45, %v2046_v33  ;;  %2838 = vmatprep.subr.mxu0 %v3381_v13  ;;  %v2283_v32 = vld [vmem:[%s4648_s20 + $0x10] sm:$0xff]  ;;  %v2282_v54 = vld [vmem:[%s4648_s20 + $0x8] sm:$0xff]  ;;  %v2682_v58 = vld [vmem:[%s4649_s8] ss:$0 sm:$0xff] }
 0x2ef   : > { %v2076_v9 = vsel %vm2075_vm1, %v2030_v36, %v2024_v8  ;;  %2839 = vmatpush3.msra.mxu0 %v2293_v43 }
 0x2f0   : > { %v2057_v60 = vrot.slane %v2056_v11, 2  ;;  %v2061_v16 = vrot.slane %v2018_v19, 4  ;;  %v2053_v37 = vrot.slane %v2052_v56, 1  ;;  %v2078_v44 = vsel %vm2077_vm2, %v2036_v30, %v2076_v9  ;;  %2840 = vmatprep.subr.mxu0 %v3381_v13 }
 0x2f1   : > { %v2080_v49 = vsel %vm2079_vm3, %v2042_v15, %v2078_v44  ;;  %2841 = vmatpush3.msra.mxu0 %v2292_v4 }
 0x2f2   : > { %v2058_v63 = vadd.f32 %v2057_v60, %v2056_v11  ;;  %v2062_v62 = vadd.f32 %v2061_v16, %v2018_v19  ;;  %v2054_v48 = vadd.f32 %v2053_v37, %v2052_v56  ;;  %v2082_v55 = vsel %vm2081_vm4, %v2048_v1, %v2080_v49  ;;  %2842 = vmatprep.subr.mxu0 %v3381_v13  ;;  %v2683_v19 = vld [vmem:[%s4651_s15] ss:$0 sm:$0xff] }
 0x2f3   : > { %2843 = vmatpush3.msra.mxu0 %v2291_v52 }
 0x2f4   : > { %v2059_v29 = vrot.slane %v2058_v63, 1  ;;  %v2063_v21 = vrot.slane %v2062_v62, 2  ;;  %v2084_v14 = vsel %vm2083_vm5, %v2054_v48, %v2082_v55  ;;  %2844 = vmatprep.subr.mxu0 %v3381_v13 }
 0x2f5   : > { %2845 = vmatpush3.msra.mxu0 %v2290_v40 }
 0x2f6   : > { %v2064_v23 = vadd.f32 %v2063_v21, %v2062_v62  ;;  %v2060_v47 = vadd.f32 %v2059_v29, %v2058_v63  ;;  %2846 = vmatprep.subr.mxu0 %v3381_v13 }
 0x2f7   : > { %2847 = vmatpush3.msra.mxu0 %v2289_v46 }
 0x2f8   : > { %v2065_v38 = vrot.slane %v2064_v23, 1  ;;  %v2086_v3 = vsel %vm2085_vm6, %v2060_v47, %v2084_v14  ;;  %2848 = vmatprep.subr.mxu0 %v3381_v13 }
 0x2f9   : > { %2849 = vmatpush3.msra.mxu0 %v2288_v57 }
 0x2fa   : > { %v2066_v20 = vadd.f32 %v2065_v38, %v2064_v23  ;;  %2850 = vmatprep.subr.mxu0 %v3381_v13 }
 0x2fb   : > { %2851 = vmatpush3.msra.mxu0 %v2287_v39 }
 0x2fc   : > { %v2088_v27 = vsel %vm2087_vm7, %v2066_v20, %v2086_v3  ;;  %2852 = vmatprep.subr.mxu0 %v3381_v13 }
 0x2fd   : > { %v2103_v22 = vmul.f32 %v2101_v53, %v2088_v27  ;;  %2853 = vmatpush3.msra.mxu0 %v2286_v18 }
 0x2fe   : > { %2854 = vmatprep.subr.mxu0 %v3381_v13 }
 0x2ff   : > { %2819 = vmatmul.mubr.f32.vlgmr.msra.gmra.mxu1 %v2103_v22  ;;  %2855 = vmatpush3.msra.mxu0 %v2285_v59 }
 0x300   : > { %2822 = vmatpush3.msra.mxu1 %v2107_v6  ;;  %2829 = vmatprep.mubr.msk.f32.mxu1 %vm3382_vm0, %v3381_v13 }
 0x301   : > { %2823 = vmatprep.subr.mxu1 %v3381_v13  ;;  %2856 = vmatprep.subr.mxu0 %v3381_v13 }
 0x302   : > { %2824 = vmatpush3.msra.mxu1 %v2106_v24  ;;  %2857 = vmatpush3.msra.mxu0 %v2284_v41 }
 0x303   : > { %2825 = vmatprep.subr.mxu1 %v3381_v13  ;;  %2858 = vmatprep.subr.mxu0 %v3381_v13 }
 0x304   : > { %2826 = vmatpush3.msra.mxu1 %v2105_v7  ;;  %2859 = vmatpush3.msra.mxu0 %v2283_v32 }
 0x305   : > { %2827 = vmatprep.subr.mxu1 %v3381_v13  ;;  %2860 = vmatprep.subr.mxu0 %v3381_v13 }
 0x306   : > { %2828 = vmatpush3.msra.mxu1 %v2104_v12  ;;  %2861 = vmatpush3.msra.mxu0 %v2282_v54 }
 0x307   : > { %2830 = vmatmul.mubr.msk.f32.vlgmr.msra.gmra.mxu1 %vm2194_vm8, %v4437_v31  ;;  %2862 = vmatprep.subr.mxu0 %v3381_v13 }
 0x308   : > { %2863 = vmatpush3.msra.mxu0 %v2281_v5 }
 0x3bf   : > { %v2190_v10 = vpop.f32.mrf.mxu1 }
 0x3c1   : > { %v2820_v17 = vpop.f32.mrf.mxu1 }
 0x3c7   : > { %v2264_v26 = vpop.f32.mrf.mxu1 }
 0x3c8   : > { %v2265_v35 = vadd.f32 %v2264_v26, %v2190_v10 }
 0x3c9   : > { %v2831_v50 = vpop.f32.mrf.mxu1 }
 0x3ca   : > { %v2275_v61 = vadd.f32 %v2682_v58, %v2265_v35 }
 0x3cc   : > { %v2276_v33 = vmul.f32 0.5, %v2275_v61 }
 0x3ce   : > { %3047 = vtanh.f32 %v2276_v33 }
 0x3db   : > { %v3048_v11 = vpop.eup %3047 }
 0x3dc   : > { %v2278_v42 = vmul.f32 0.5, %v3048_v11 }
 0x3de   : > { %v2279_v56 = vadd.f32 0.5, %v2278_v42 }
 0x3e0   : > { %v2280_v13 = vmul.f32 %v2279_v56, %v2275_v61 }
 0x3e2   : > { %2865 = vmatmul.mubr.f32.vlgmr.msra.gmra.mxu0 %v2280_v13 }
 0x4a2   : > { %v2370_v28 = vpop.f32.mrf.mxu0 }
 0x4a3   : > { %v2371_v60 = vadd.f32 %v2683_v19, %v2370_v28 }
 0x4a4   : > { %v2866_v34 = vpop.f32.mrf.mxu0 }
 0x4a5   : > { %v2374_v0 = vadd.f32 %v2371_v60, %v4437_v31 }
 0x4a7   : > { %2375 = vst.msk [vmem:[%s852_s12] sm:$0xff] %vm2194_vm8, %v2374_v0 }
 0x4a8   : > { %3278 = shalt.err (!%p3275_p8)
}
 0x4a9   : > { %s3279_s18 = scalar_lea.hbm %s2389_s14, 128  ;;  %s3283_s9 = scalar_lea.hbm %s4652_s6, 256 }
 0x4aa   : > { %p3280_p13 = scmp.ne.s32.totalorder %s2389_s14, %s3279_s18  ;;  %p3284_p11 = scmp.lt.s32.totalorder %s2389_s14, %s4652_s6 }
 0x4ab   : > { %p3285_p10 = scmp.lt.s32.totalorder %s3283_s9, %s3279_s18 }
 0x4ac   : > { %p3281_p9 = pnand %p3280_p13, %p3565_p7 }
 0x4ad   : > { %p3286_p5 = por %p3285_p10, %p3284_p11 }
 0x4ae   : > { %p3282_p3 = pneg %p3281_p9 }
 0x4b0   : > { %p3287_p1 = pnand %p3286_p5, %p3282_p3 }
 0x4b2   : > { %3290 = shalt.err (!%p3287_p1)
}
 0x4b3   : > { %2891 = dma.vmem_to_hbm [thread:$0]  (%p3565_p7), %s2392_s10, 128, %s2389_s14, %s2377_s26  }
 0x4b4 PF: > { %s4653_s0 = sld [smem:[#allocation25_spill]]  ;;  %p4656_p4 = scmp.ge.s32.totalorder %s3365_s29, 2 }
 0x4b5   : > { %s4654_s8 = sld [smem:[#allocation27_spill]] }
 0x4ba   : > { %s2403_s19 = sand.u32 1, %s4653_s0  }
 0x4bb   : > { %p4655_p2 = scmp.ne.s32.totalorder %s4654_s8, 0  ;;  %s2404_s22 = scalar_lea.sflag [#allocation5], %s2403_s19 }
 0x4bd   : > { %p2920_p6 = pnand %p4656_p4, %p4655_p2 }
 0x4bf   : > { %p2921_p12 = pneg %p2920_p6 }
 0x4c1   : > { %3340 = dma.done.wait (%p2921_p12), %s2404_s22, 128  }
 0x4c2   : > { %3342 = vsyncadd (%p2921_p12), %s2404_s22, 4294967168  ;;  %s41_s29 = sadd.s32 1, %s3365_s29   ;;  %s4657_s15 = sld [smem:[#allocation26_spill]] }
 0x4c3   : > { %p38_p0 = scmp.ge.s32.totalorder %s41_s29, 4   ;;  %s4658_s26 = sld [smem:[#allocation30_spill]] }
 0x4c4   : > { %s4659_s30 = sld [smem:[#allocation28_spill]]  ;;  %s4660_s24 = smov %s3349_s25 }
 0x4c5   : > { %s4662_s27 = smov %s3361_s28 }
 0x4c6   :  { %40 = sbr.rel (!%p38_p0) target bundleno = 29 (0x1d), region = 206 }
 0x4c8   : > { %s4661_s25 = smov %s4657_s15 }
 0x4ca   : > { %s4663_s28 = smov %s4659_s30 }
 0x4cb   :  { %2409 = vsyncpa [#allocation4], 1 }
 0x4cc   :  { %2411 = vsyncpa [#allocation4 + $0x1], 1 }
 0x4cd   :  { %2412 = vsyncpa [#allocation7], 1 }
 0x4ce   :  { %2414 = vsyncpa [#allocation7 + $0x1], 1 }
 0x4cf   :  { %2415 = vsyncpa [#allocation10], 1 }
 0x4d0   :  { %2417 = vsyncpa [#allocation10 + $0x1], 1 }
 0x4d1   :  { %2418 = vsyncpa [#allocation13], 1 }
 0x4d2   :  { %2419 = vsyncpa [#allocation16], 1 }
 0x4d3   :  { %2420 = vsyncpa [#allocation5], 1 }
 0x4d4   :  { %2422 = vsyncpa [#allocation5 + $0x1], 1 }

</bundles_post_ra>
